<compile_context>
chip_gen: v5e
topology: v5e:2x2
jax: 0.10.0
libtpu: 0.0.40
codegen_flags: <defaults>
</compile_context>

<pallas_src>
import functools
import math

import jax
import jax.numpy as jnp
from jax.experimental import pallas as pl
from jax.experimental.pallas import tpu as pltpu


_LN_EPS = 1e-5
_NEG_BIAS = -1e9        # finite "masked key" bias (exp underflows to 0, no NaNs)


def _detect_vmem_capacity():
    try:
        cap = getattr(pltpu.get_tpu_info(), "vmem_capacity_bytes", None)
        if cap:
            return int(cap)
    except Exception:
        pass
    return 64 * 1024 * 1024                 # conservative fallback (v7x per-core VMEM)


_VMEM_CAP = _detect_vmem_capacity()
_SMALL_VMEM = _VMEM_CAP < 96 * 1024 * 1024  # v7x-class (64 MiB per core)
_VMEM_LIMIT = int(_VMEM_CAP * 0.80)         # leave headroom for compiler scratch
_LIN_TILE = 512 if _SMALL_VMEM else 1024    # row-tile targets (bigger on 128 MiB parts)
_FFN_TILE = 256 if _SMALL_VMEM else 512


def _cparams(n_parallel_axes):
    return pltpu.CompilerParams(
        dimension_semantics=("parallel",) * n_parallel_axes,
        vmem_limit_bytes=_VMEM_LIMIT)


def _round_up(x, n):
    return ((x + n - 1) // n) * n


def _row_tile(m, target, multiple=8):
    """Row tile + padded row count.  Tiles are multiples of `multiple` so blocks
    always satisfy the (8,128)/(16,128) sublane tiling; callers pad M up to pm."""
    if m <= target:
        pm = _round_up(m, multiple)
        return pm, pm
    t = max(multiple, (target // multiple) * multiple)
    return t, _round_up(m, t)


def _pad_rows(a, pm):
    m = a.shape[0]
    if pm == m:
        return a
    return jnp.pad(a, ((0, pm - m),) + ((0, 0),) * (a.ndim - 1))


def _q_tile(length, batch):
    """Query-row tile: keep >= 2 parallel grid points for megacore when possible."""
    if batch >= 2:
        for t in (256, 128):
            if length > t and length % t == 0:
                return t
        return length
    for t in (256, 128, 64, 32, 16):
        if length % t == 0 and length // t >= 2:
            return t
    return length


def _spec(shape, index_map, buffers=None):
    """BlockSpec; buffers=1 single-buffers grid-invariant / resident operands."""
    if buffers is not None and hasattr(pl, "Buffered"):
        try:
            return pl.BlockSpec(shape, index_map, pipeline_mode=pl.Buffered(buffers))
        except TypeError:       # older jax without pipeline_mode: default buffering
            pass
    return pl.BlockSpec(shape, index_map)


# ------------------------------------------------------------------ kernels

def _linear_kernel(x_ref, w_ref, b_ref, o_ref):
    y = jnp.dot(x_ref[...].astype(jnp.bfloat16), w_ref[...],
                preferred_element_type=jnp.float32) + b_ref[...]
    o_ref[...] = y.astype(o_ref.dtype)


def _linear_mask_kernel(x_ref, w_ref, b_ref, m_ref, o_ref):
    # (x @ W + b) * valid — zeroes embeddings (incl. bias) at missing steps,
    # matching `inp_x = inp_x * missing_mask.unsqueeze(-1)` in PyTorch.
    y = jnp.dot(x_ref[...].astype(jnp.bfloat16), w_ref[...],
                preferred_element_type=jnp.float32) + b_ref[...]
    o_ref[...] = (y * m_ref[...]).astype(o_ref.dtype)


def _qkv_kernel(x_ref, wq_ref, bq_ref, wkv_ref, bkv_ref, q_ref, kv_ref):
    # Fused Q and KV projections (x is loaded once), bf16 outputs.
    xb = x_ref[...].astype(jnp.bfloat16)
    q_ref[...] = (jnp.dot(xb, wq_ref[...], preferred_element_type=jnp.float32)
                  + bq_ref[...]).astype(q_ref.dtype)
    kv_ref[...] = (jnp.dot(xb, wkv_ref[...], preferred_element_type=jnp.float32)
                   + bkv_ref[...]).astype(kv_ref.dtype)


def _combine_kernel(pos_ref, inp_ref, pat_ref, valid_ref, o_ref, *, scale, patch_size):
    # x = (pos + inp + repeat_interleave(pat, patch) * valid) * sqrt(E)
    pat = pat_ref[...]                           # [PP, 1, E]
    pp, _, emb = pat.shape
    if pp == 1:
        pat_rep = pat[0]                         # [1, E] broadcasts over the patch rows
    else:                                        # fallback (patch_size not multiple of 8)
        pat_rep = jnp.concatenate(
            [jnp.broadcast_to(pat[i], (patch_size, emb)) for i in range(pp)], axis=0)
    o_ref[...] = (pos_ref[...] + inp_ref[...] + pat_rep * valid_ref[...]) * scale


def _attn_block_kernel(q_ref, kv_ref, bias_ref, res_ref, wo_ref, bo_ref, g_ref, be_ref,
                       o_ref, *, num_heads, head_dim, scale, eps):
    """Fused: MHA + out-projection + residual add + LayerNorm."""
    emb = num_heads * head_dim
    qq = q_ref[...]                              # [TQ, E]   (bf16)
    kv = kv_ref[...]                             # [L, 2E]   (bf16, VMEM-resident)
    bias = bias_ref[...]                         # [1, L]    (f32)

    # TODO(synk): a head-leading [B,H,L,Dh] layout would avoid these per-head
    # lane slices; kept as a small unrolled loop to stay transpose-free in HBM.
    outs = []
    for hd in range(num_heads):
        q = qq[:, hd * head_dim:(hd + 1) * head_dim]
        k = kv[:, hd * head_dim:(hd + 1) * head_dim]
        v = kv[:, emb + hd * head_dim: emb + (hd + 1) * head_dim]
        s = jax.lax.dot_general(q, k, (((1,), (1,)), ((), ())),
                                preferred_element_type=jnp.float32) * scale
        s = s + bias                             # key-padding bias
        s = s - jnp.max(s, axis=-1, keepdims=True)
        p = jnp.exp(s)
        p = p * pl.reciprocal(jnp.sum(p, axis=-1, keepdims=True), approx=True)
        outs.append(jnp.dot(p.astype(jnp.bfloat16), v,
                            preferred_element_type=jnp.float32))
    attn = jnp.concatenate(outs, axis=-1)        # [TQ, E], lane-dense

    proj = jnp.dot(attn.astype(jnp.bfloat16), wo_ref[...],
                   preferred_element_type=jnp.float32) + bo_ref[...]
    z = res_ref[...] + proj                      # post-norm residual
    mu = jnp.mean(z, axis=-1, keepdims=True)
    var = jnp.mean((z - mu) ** 2, axis=-1, keepdims=True)
    o_ref[...] = (z - mu) * jax.lax.rsqrt(var + eps) * g_ref[...] + be_ref[...]


def _ffn_ln_kernel(x_ref, w1_ref, b1_ref, w2_ref, b2_ref, g_ref, be_ref, o_ref, *, eps):
    """Fused: relu-MLP + residual add + LayerNorm (row tile)."""
    x = x_ref[...]
    h = jnp.maximum(jnp.dot(x.astype(jnp.bfloat16), w1_ref[...],
                            preferred_element_type=jnp.float32) + b1_ref[...], 0.0)
    y = jnp.dot(h.astype(jnp.bfloat16), w2_ref[...],
                preferred_element_type=jnp.float32) + b2_ref[...]
    z = x + y
    mu = jnp.mean(z, axis=-1, keepdims=True)
    var = jnp.mean((z - mu) ** 2, axis=-1, keepdims=True)
    o_ref[...] = (z - mu) * jax.lax.rsqrt(var + eps) * g_ref[...] + be_ref[...]


def _ln_head_kernel(x_ref, g_ref, be_ref, w_ref, b_ref, o_ref, *, eps):
    """Fused: final LayerNorm + head Linear(E -> C)."""
    x = x_ref[...]
    mu = jnp.mean(x, axis=-1, keepdims=True)
    var = jnp.mean((x - mu) ** 2, axis=-1, keepdims=True)
    y = (x - mu) * jax.lax.rsqrt(var + eps) * g_ref[...] + be_ref[...]
    o_ref[...] = jnp.dot(y.astype(jnp.bfloat16), w_ref[...],
                         preferred_element_type=jnp.float32) + b_ref[...]


# ------------------------------------------------------------------ wrappers

def linear(x, w, b, tile_target=None):
    M, K = x.shape
    N = w.shape[1]
    tm, pm = _row_tile(M, tile_target or _LIN_TILE)
    xp = _pad_rows(x, pm)
    out = pl.pallas_call(
        _linear_kernel,
        out_shape=jax.ShapeDtypeStruct((pm, N), jnp.float32),
        grid=(pm // tm,),
        in_specs=[pl.BlockSpec((tm, K), lambda i: (i, 0)),
                  _spec((K, N), lambda i: (0, 0), 1),       # weight resident, 1 buffer
                  _spec((1, N), lambda i: (0, 0), 1)],
        out_specs=pl.BlockSpec((tm, N), lambda i: (i, 0)),
        compiler_params=_cparams(1),
    )(xp, w, b)
    return out[:M]


def linear_mask(x, w, b, m, tile_target=None):
    M, K = x.shape
    N = w.shape[1]
    tm, pm = _row_tile(M, tile_target or _LIN_TILE)
    xp, mp = _pad_rows(x, pm), _pad_rows(m, pm)
    out = pl.pallas_call(
        _linear_mask_kernel,
        out_shape=jax.ShapeDtypeStruct((pm, N), jnp.float32),
        grid=(pm // tm,),
        in_specs=[pl.BlockSpec((tm, K), lambda i: (i, 0)),
                  _spec((K, N), lambda i: (0, 0), 1),
                  _spec((1, N), lambda i: (0, 0), 1),
                  pl.BlockSpec((tm, 1), lambda i: (i, 0))],  # per-row valid mask
        out_specs=pl.BlockSpec((tm, N), lambda i: (i, 0)),
        compiler_params=_cparams(1),
    )(xp, w, b, mp)
    return out[:M]


def qkv_project(x, w_q, b_q, w_kv, b_kv):
    """Fused Q / KV projection: x [M, E] -> Q [M, E] bf16, KV [M, 2E] bf16."""
    M, E = x.shape
    tm, pm = _row_tile(M, _LIN_TILE, multiple=16)   # bf16 outputs -> 16-row sublane pack
    xp = _pad_rows(x, pm)
    q, kv = pl.pallas_call(
        _qkv_kernel,
        out_shape=(jax.ShapeDtypeStruct((pm, E), jnp.bfloat16),
                   jax.ShapeDtypeStruct((pm, 2 * E), jnp.bfloat16)),
        grid=(pm // tm,),
        in_specs=[pl.BlockSpec((tm, E), lambda i: (i, 0)),
                  _spec((E, E), lambda i: (0, 0), 1),
                  _spec((1, E), lambda i: (0, 0), 1),
                  _spec((E, 2 * E), lambda i: (0, 0), 1),
                  _spec((1, 2 * E), lambda i: (0, 0), 1)],
        out_specs=(pl.BlockSpec((tm, E), lambda i: (i, 0)),
                   pl.BlockSpec((tm, 2 * E), lambda i: (i, 0))),
        compiler_params=_cparams(1),
    )(xp, w_q, b_q, w_kv, b_kv)
    return q[:M], kv[:M]


def combine(pos, inp, pat, valid, scale, patch_size):
    """(pos + inp + repeat_interleave(pat)*valid) * sqrt(E), tiled over (B, P)."""
    B, L, E = inp.shape
    P = pat.shape[1]
    if patch_size % 8 == 0:
        pp, rows = 1, patch_size                 # one patch per grid step (B*P points)
    else:
        pp, rows = P, L                          # fallback: whole sequence per batch
    nj = P // pp
    pat4 = pat.reshape(B, P, 1, E)
    kern = functools.partial(_combine_kernel, scale=scale, patch_size=patch_size)
    return pl.pallas_call(
        kern,
        out_shape=jax.ShapeDtypeStruct((B, L, E), jnp.float32),
        grid=(B, nj),
        in_specs=[pl.BlockSpec((rows, E), lambda b, j: (j, 0)),           # pos rows
                  pl.BlockSpec((None, rows, E), lambda b, j: (b, j, 0)),
                  pl.BlockSpec((None, pp, 1, E), lambda b, j: (b, j, 0, 0)),
                  pl.BlockSpec((None, rows, 1), lambda b, j: (b, j, 0))],
        out_specs=pl.BlockSpec((None, rows, E), lambda b, j: (b, j, 0)),
        compiler_params=_cparams(2),
    )(pos, inp, pat4, valid)


def attention_block(q, kv, key_bias, resid, w_out, b_out, ln_g, ln_b, *,
                    num_heads, eps=_LN_EPS):
    """MHA + out-proj + residual + LN.  q: [B,L,E] bf16, kv: [B,L,2E] bf16."""
    B, L, E = q.shape
    Dh = E // num_heads
    tq = _q_tile(L, B)
    nq = L // tq
    kern = functools.partial(_attn_block_kernel, num_heads=num_heads, head_dim=Dh,
                             scale=1.0 / math.sqrt(Dh), eps=eps)
    # K/V stay VMEM-resident across the q axis; single-buffer them on small-VMEM
    # (v7x) parts so the [L, 2E] block is not double-buffered across batches.
    kv_buffers = 1 if _SMALL_VMEM else None
    # TODO(synk): flash-style K/V-block tiling (online softmax) for very long L,
    # and fusing the QKV projection into this kernel (v5e bandwidth), not done.
    return pl.pallas_call(
        kern,
        out_shape=jax.ShapeDtypeStruct((B, L, E), jnp.float32),
        grid=(B, nq),
        in_specs=[
            pl.BlockSpec((None, tq, E), lambda b, i: (b, i, 0)),           # Q rows only
            _spec((None, L, 2 * E), lambda b, i: (b, 0, 0), kv_buffers),   # K/V (no Q third)
            pl.BlockSpec((None, 1, L), lambda b, i: (b, 0, 0)),            # key-padding bias
            pl.BlockSpec((None, tq, E), lambda b, i: (b, i, 0)),           # residual
            _spec((E, E), lambda b, i: (0, 0), 1),                         # W_out resident
            _spec((1, E), lambda b, i: (0, 0), 1),
            _spec((1, E), lambda b, i: (0, 0), 1),
            _spec((1, E), lambda b, i: (0, 0), 1),
        ],
        out_specs=pl.BlockSpec((None, tq, E), lambda b, i: (b, i, 0)),
        compiler_params=_cparams(2),
    )(q, kv, key_bias, resid, w_out, b_out, ln_g, ln_b)


def ffn_add_ln(x, w1, b1, w2, b2, g, be, eps=_LN_EPS):
    M, E = x.shape
    F = w1.shape[1]
    tm, pm = _row_tile(M, _FFN_TILE)
    xp = _pad_rows(x, pm)
    out = pl.pallas_call(
        functools.partial(_ffn_ln_kernel, eps=eps),
        out_shape=jax.ShapeDtypeStruct((pm, E), jnp.float32),
        grid=(pm // tm,),
        in_specs=[pl.BlockSpec((tm, E), lambda i: (i, 0)),
                  _spec((E, F), lambda i: (0, 0), 1),
                  _spec((1, F), lambda i: (0, 0), 1),
                  _spec((F, E), lambda i: (0, 0), 1),
                  _spec((1, E), lambda i: (0, 0), 1),
                  _spec((1, E), lambda i: (0, 0), 1),
                  _spec((1, E), lambda i: (0, 0), 1)],
        out_specs=pl.BlockSpec((tm, E), lambda i: (i, 0)),
        compiler_params=_cparams(1),
    )(xp, w1, b1, w2, b2, g, be)
    return out[:M]


def ln_head(x, g, be, w, b, eps=_LN_EPS):
    M, E = x.shape
    C = w.shape[1]
    tm, pm = _row_tile(M, _LIN_TILE)
    xp = _pad_rows(x, pm)
    out = pl.pallas_call(
        functools.partial(_ln_head_kernel, eps=eps),
        out_shape=jax.ShapeDtypeStruct((pm, C), jnp.float32),
        grid=(pm // tm,),
        in_specs=[pl.BlockSpec((tm, E), lambda i: (i, 0)),
                  _spec((1, E), lambda i: (0, 0), 1),
                  _spec((1, E), lambda i: (0, 0), 1),
                  _spec((E, C), lambda i: (0, 0), 1),
                  _spec((1, C), lambda i: (0, 0), 1)],
        out_specs=pl.BlockSpec((tm, C), lambda i: (i, 0)),
        compiler_params=_cparams(1),
    )(xp, g, be, w, b)
    return out[:M]


# ------------------------------------------------------------------ model

def init_params(key, *, input_len, patch_size, in_channels, embed_dim,
                mlp_ratio, depth):
    ff = int(embed_dim * mlp_ratio)

    def nrm(k, shape, scale=0.02):
        return scale * jax.random.normal(k, shape, jnp.float32)

    keys = jax.random.split(key, 5 + depth)
    params = {
        'w_inp': nrm(keys[0], (in_channels, embed_dim)),
        'b_inp': jnp.zeros((embed_dim,), jnp.float32),
        'pos_embed': nrm(keys[1], (input_len, embed_dim)),
        # Conv2d weight W[e_out, e_in, k, 0] stored flattened: [k*E+e_in, e_out]
        'w_patch': nrm(keys[2], (patch_size * embed_dim, embed_dim)),
        'b_patch': jnp.zeros((embed_dim,), jnp.float32),
        'w_head': nrm(keys[3], (embed_dim, in_channels)),
        'b_head': jnp.zeros((in_channels,), jnp.float32),
        'ln_f_g': jnp.ones((embed_dim,), jnp.float32),
        'ln_f_b': jnp.zeros((embed_dim,), jnp.float32),
        'layers': [],
    }
    for d in range(depth):
        lk = jax.random.split(keys[4 + d], 4)
        params['layers'].append({
            # QKV output columns ordered [q | k | v], heads contiguous inside each
            'w_qkv': nrm(lk[0], (embed_dim, 3 * embed_dim)),
            'b_qkv': jnp.zeros((3 * embed_dim,), jnp.float32),
            'w_out': nrm(lk[1], (embed_dim, embed_dim)),
            'b_out': jnp.zeros((embed_dim,), jnp.float32),
            'ln1_g': jnp.ones((embed_dim,), jnp.float32),
            'ln1_b': jnp.zeros((embed_dim,), jnp.float32),
            'w1': nrm(lk[2], (embed_dim, ff)),
            'b1': jnp.zeros((ff,), jnp.float32),
            'w2': nrm(lk[3], (ff, embed_dim)),
            'b2': jnp.zeros((embed_dim,), jnp.float32),
            'ln2_g': jnp.ones((embed_dim,), jnp.float32),
            'ln2_b': jnp.zeros((embed_dim,), jnp.float32),
        })
    return params


def prepare_params(params):
    """One-time preparation (outside jit): split QKV weights into Q / KV, cast all
    matmul weights to bf16 once, reshape biases / LN params to (1, N) rows."""
    E = params['pos_embed'].shape[1]
    prepped = {
        'w_inp': params['w_inp'].astype(jnp.bfloat16),
        'b_inp': params['b_inp'].reshape(1, -1),
        'pos_embed': params['pos_embed'],
        'w_patch': params['w_patch'].astype(jnp.bfloat16),
        'b_patch': params['b_patch'].reshape(1, -1),
        'w_head': params['w_head'].astype(jnp.bfloat16),
        'b_head': params['b_head'].reshape(1, -1),
        'ln_f_g': params['ln_f_g'].reshape(1, -1),
        'ln_f_b': params['ln_f_b'].reshape(1, -1),
        'layers': [],
    }
    for lp in params['layers']:
        prepped['layers'].append({
            'w_q': lp['w_qkv'][:, :E].astype(jnp.bfloat16),
            'b_q': lp['b_qkv'][:E].reshape(1, -1),
            'w_kv': lp['w_qkv'][:, E:].astype(jnp.bfloat16),
            'b_kv': lp['b_qkv'][E:].reshape(1, -1),
            'w_out': lp['w_out'].astype(jnp.bfloat16),
            'b_out': lp['b_out'].reshape(1, -1),
            'ln1_g': lp['ln1_g'].reshape(1, -1),
            'ln1_b': lp['ln1_b'].reshape(1, -1),
            'w1': lp['w1'].astype(jnp.bfloat16),
            'b1': lp['b1'].reshape(1, -1),
            'w2': lp['w2'].astype(jnp.bfloat16),
            'b2': lp['b2'].reshape(1, -1),
            'ln2_g': lp['ln2_g'].reshape(1, -1),
            'ln2_b': lp['ln2_b'].reshape(1, -1),
        })
    return prepped


def encoder_layer(p, h, key_bias, num_heads):
    """One post-norm nn.TransformerEncoderLayer (eval mode), three fused kernels."""
    B, L, E = h.shape
    h2d = h.reshape(B * L, E)
    # Q / KV projection (fused, bf16 outputs) — KV no longer carries a Q third.
    q, kv = qkv_project(h2d, p['w_q'], p['b_q'], p['w_kv'], p['b_kv'])
    q = q.reshape(B, L, E)
    kv = kv.reshape(B, L, 2 * E)
    # MHA + out-proj + residual + LN1 — no [B,H,L,Dh] transposes, lane-dense output.
    h1 = attention_block(q, kv, key_bias, h, p['w_out'], p['b_out'],
                         p['ln1_g'], p['ln1_b'], num_heads=num_heads)
    # FFN + residual + LN2.
    # TODO(synk): optional bf16 residual stream (halves [B,L,E] HBM traffic) not enabled.
    h2 = ffn_add_ln(h1.reshape(B * L, E), p['w1'], p['b1'], p['w2'], p['b2'],
                    p['ln2_g'], p['ln2_b'])
    return h2.reshape(B, L, E)


@functools.partial(jax.jit, static_argnames=("patch_size", "num_heads"))
def _ptsm_apply(params, x, missing_mask, *, patch_size, num_heads):
    B, L, C = x.shape
    E = params['pos_embed'].shape[1]
    P = L // patch_size

    valid = (missing_mask == 0).astype(jnp.float32)               # ~missing_mask.bool()

    # inp_embed + masking of missing time steps
    inp = linear_mask(x.reshape(B * L, C), params['w_inp'], params['b_inp'],
                      valid.reshape(B * L, 1)).reshape(B, L, E)

    # patch_embed: Conv2d(E, E, (patch,1), stride=patch) == per-patch linear
    pat = linear(inp.reshape(B * P, patch_size * E),
                 params['w_patch'], params['b_patch']).reshape(B, P, E)

    # pos + inp + repeat_interleave(pat)*valid, then * sqrt(E); repeat fused in-kernel
    h = combine(params['pos_embed'][:L], inp, pat, valid[:, :, None],
                math.sqrt(E), patch_size)

    # transformer encoder with src_key_padding_mask = missing positions
    key_bias = jnp.where(missing_mask > 0, _NEG_BIAS,
                         0.0).astype(jnp.float32).reshape(B, 1, L)
    for layer in params['layers']:
        h = encoder_layer(layer, h, key_bias, num_heads)

    # final encoder LayerNorm + head Linear(E -> C), fused
    out = ln_head(h.reshape(B * L, E), params['ln_f_g'], params['ln_f_b'],
                  params['w_head'], params['b_head']).reshape(B, L, C)
    return out


def ptsm_forward(params, x, missing_mask, *, patch_size, num_heads):
    """x: [B, L, C]; missing_mask: [B, L] (1 = missing). Returns ([B,L,C], masked_idx)."""
    out = _ptsm_apply(params, x, missing_mask,
                      patch_size=patch_size, num_heads=num_heads)
    # TODO(synk): training-mode random patch zeroing (PatchMask) not implemented;
    # eval path only, matching PyTorch `self.training == False`.
    masked_idx = list(range(x.shape[1]))
    return out, masked_idx


# ------------------------------------------------------------------ demo

if __name__ == "__main__":
    B, L, C = 2, 16, 4
    patch_size = 8
    E, num_heads, depth = 32, 2, 2
    mlp_ratio = 2.0

    key = jax.random.PRNGKey(0)
    kp, kx = jax.random.split(key)
    raw_params = init_params(kp, input_len=L, patch_size=patch_size,
                             in_channels=C, embed_dim=E,
                             mlp_ratio=mlp_ratio, depth=depth)
    params = prepare_params(raw_params)     # one-time bf16 cast + Q/KV weight split

    x = jax.random.normal(kx, (B, L, C), jnp.float32)
    # 1 = missing; mark the last two time steps of each series as missing.
    missing_mask = jnp.zeros((B, L), jnp.int32).at[:, -2:].set(1)

    out, masked_idx = ptsm_forward(params, x, missing_mask,
                                   patch_size=patch_size, num_heads=num_heads)
    out = jax.block_until_ready(out)

    assert out.shape == (B, L, C)
    assert bool(jnp.all(jnp.isfinite(out)))
    assert masked_idx == list(range(L))
    print("KERNEL_OK")
</pallas_src>

<mosaic_0001>
module attributes {stable_mosaic.version = 11 : i64} {
  func.func @_linear_mask_kernel(%arg0: i32, %arg1: memref<32x4xf32, #tpu.memory_space<vmem>>, %arg2: memref<4x32xbf16, #tpu.memory_space<vmem>>, %arg3: memref<1x32xf32, #tpu.memory_space<vmem>>, %arg4: memref<32x1xf32, #tpu.memory_space<vmem>>, %arg5: memref<32x32xf32, #tpu.memory_space<vmem>>) attributes {dimension_semantics = [#tpu.dimension_semantics<parallel>], iteration_bounds = array<i64: 1>, scalar_prefetch = 0 : i64, scratch_operands = 0 : i64, tpu.core_type = #tpu.core_type<tc>, window_params = [{transform_indices = @transform_0, window_bounds = array<i64: 32, 4>}, {pipeline_mode = #tpu.pipeline_mode<synchronous>, transform_indices = @transform_1, window_bounds = array<i64: 4, 32>}, {pipeline_mode = #tpu.pipeline_mode<synchronous>, transform_indices = @transform_2, window_bounds = array<i64: 1, 32>}, {transform_indices = @transform_3, window_bounds = array<i64: 32, 1>}, {transform_indices = @transform_4, window_bounds = array<i64: 32, 32>}]} {
    %c0 = arith.constant 0 : index
    %c0_0 = arith.constant 0 : index
    %0 = vector.load %arg1[%c0, %c0_0] : memref<32x4xf32, #tpu.memory_space<vmem>>, vector<32x4xf32>
    %1 = arith.truncf %0 : vector<32x4xf32> to vector<32x4xbf16>
    %c0_1 = arith.constant 0 : index
    %c0_2 = arith.constant 0 : index
    %2 = vector.load %arg2[%c0_1, %c0_2] : memref<4x32xbf16, #tpu.memory_space<vmem>>, vector<4x32xbf16>
    %cst = arith.constant dense<0.000000e+00> : vector<32x32xf32>
    %3 = tpu.matmul %1, %2, %cst {dimension_numbers = #tpu.dot_dimension_numbers<[1], [0], [0], [1], [0, 0, 1, 1], [], []>} : vector<32x4xbf16>, vector<4x32xbf16>, vector<32x32xf32> -> vector<32x32xf32>
    %c0_3 = arith.constant 0 : index
    %c0_4 = arith.constant 0 : index
    %4 = vector.load %arg3[%c0_3, %c0_4] : memref<1x32xf32, #tpu.memory_space<vmem>>, vector<1x32xf32>
    %5 = vector.broadcast %4 : vector<1x32xf32> to vector<32x32xf32>
    %6 = arith.addf %3, %5 : vector<32x32xf32>
    %c0_5 = arith.constant 0 : index
    %c0_6 = arith.constant 0 : index
    %7 = vector.load %arg4[%c0_5, %c0_6] : memref<32x1xf32, #tpu.memory_space<vmem>>, vector<32x1xf32>
    %8 = vector.broadcast %7 : vector<32x1xf32> to vector<32x32xf32>
    %9 = arith.mulf %6, %8 : vector<32x32xf32>
    %c0_7 = arith.constant 0 : index
    %c0_8 = arith.constant 0 : index
    %10 = vector.load %arg5[%c0_7, %c0_8] : memref<32x32xf32, #tpu.memory_space<vmem>>, vector<32x32xf32>
    tpu.vector_store %arg5[%c0_7, %c0_8], %9 {strides = array<i32>} : memref<32x32xf32, #tpu.memory_space<vmem>>, vector<32x32xf32>,
    return
  }
  func.func @transform_0(%arg0: i32) -> (i32, i32) {
    %c0_i32 = arith.constant 0 : i32
    %c0_i32_0 = arith.constant 0 : i32
    return %arg0, %c0_i32 : i32, i32
  }
  func.func @transform_1(%arg0: i32) -> (i32, i32) {
    %c0_i32 = arith.constant 0 : i32
    %c0_i32_0 = arith.constant 0 : i32
    %c0_i32_1 = arith.constant 0 : i32
    return %c0_i32, %c0_i32_0 : i32, i32
  }
  func.func @transform_2(%arg0: i32) -> (i32, i32) {
    %c0_i32 = arith.constant 0 : i32
    %c0_i32_0 = arith.constant 0 : i32
    %c0_i32_1 = arith.constant 0 : i32
    return %c0_i32, %c0_i32_0 : i32, i32
  }
  func.func @transform_3(%arg0: i32) -> (i32, i32) {
    %c0_i32 = arith.constant 0 : i32
    %c0_i32_0 = arith.constant 0 : i32
    return %arg0, %c0_i32 : i32, i32
  }
  func.func @transform_4(%arg0: i32) -> (i32, i32) {
    %c0_i32 = arith.constant 0 : i32
    %c0_i32_0 = arith.constant 0 : i32
    return %arg0, %c0_i32 : i32, i32
  }
}

module attributes {stable_mosaic.version = 11 : i64} {
  func.func @_combine_kernel(%arg0: i32, %arg1: i32, %arg2: memref<8x32xf32, #tpu.memory_space<vmem>>, %arg3: memref<1x8x32xf32, #tpu.memory_space<vmem>>, %arg4: memref<1x1x1x32xf32, #tpu.memory_space<vmem>>, %arg5: memref<1x8x1xf32, #tpu.memory_space<vmem>>, %arg6: memref<1x8x32xf32, #tpu.memory_space<vmem>>) attributes {dimension_semantics = [#tpu.dimension_semantics<parallel>, #tpu.dimension_semantics<parallel>], iteration_bounds = array<i64: 2, 2>, scalar_prefetch = 0 : i64, scratch_operands = 0 : i64, tpu.core_type = #tpu.core_type<tc>, window_params = [{transform_indices = @transform_0, window_bounds = array<i64: 8, 32>}, {transform_indices = @transform_1, window_bounds = array<i64: 1, 8, 32>}, {transform_indices = @transform_2, window_bounds = array<i64: 1, 1, 1, 32>}, {transform_indices = @transform_3, window_bounds = array<i64: 1, 8, 1>}, {transform_indices = @transform_4, window_bounds = array<i64: 1, 8, 32>}]} {
    %c0 = arith.constant 0 : index
    %c0_0 = arith.constant 0 : index
    %c0_1 = arith.constant 0 : index
    %c0_2 = arith.constant 0 : index
    %0 = vector.load %arg4[%c0, %c0_0, %c0_1, %c0_2] : memref<1x1x1x32xf32, #tpu.memory_space<vmem>>, vector<1x1x1x32xf32>
    %1 = vector.shape_cast %0 : vector<1x1x1x32xf32> to vector<1x1x32xf32>
    %2 = vector.shape_cast %1 : vector<1x1x32xf32> to vector<1x32xf32>
    %c0_3 = arith.constant 0 : index
    %c0_4 = arith.constant 0 : index
    %3 = vector.load %arg2[%c0_3, %c0_4] : memref<8x32xf32, #tpu.memory_space<vmem>>, vector<8x32xf32>
    %c0_5 = arith.constant 0 : index
    %c0_6 = arith.constant 0 : index
    %c0_7 = arith.constant 0 : index
    %4 = vector.load %arg3[%c0_5, %c0_6, %c0_7] : memref<1x8x32xf32, #tpu.memory_space<vmem>>, vector<1x8x32xf32>
    %5 = vector.shape_cast %4 : vector<1x8x32xf32> to vector<8x32xf32>
    %6 = arith.addf %3, %5 : vector<8x32xf32>
    %c0_8 = arith.constant 0 : index
    %c0_9 = arith.constant 0 : index
    %c0_10 = arith.constant 0 : index
    %7 = vector.load %arg5[%c0_8, %c0_9, %c0_10] : memref<1x8x1xf32, #tpu.memory_space<vmem>>, vector<1x8x1xf32>
    %8 = vector.shape_cast %7 : vector<1x8x1xf32> to vector<8x1xf32>
    %9 = vector.broadcast %2 : vector<1x32xf32> to vector<8x32xf32>
    %10 = vector.broadcast %8 : vector<8x1xf32> to vector<8x32xf32>
    %11 = arith.mulf %9, %10 : vector<8x32xf32>
    %12 = arith.addf %6, %11 : vector<8x32xf32>
    %cst = arith.constant 5.65685415 : f32
    %13 = vector.broadcast %cst : f32 to vector<8x32xf32>
    %14 = arith.mulf %12, %13 : vector<8x32xf32>
    %c0_11 = arith.constant 0 : index
    %c0_12 = arith.constant 0 : index
    %c0_13 = arith.constant 0 : index
    %15 = vector.load %arg6[%c0_11, %c0_12, %c0_13] : memref<1x8x32xf32, #tpu.memory_space<vmem>>, vector<1x8x32xf32>
    %16 = vector.shape_cast %15 : vector<1x8x32xf32> to vector<8x32xf32>
    %17 = vector.shape_cast %14 : vector<8x32xf32> to vector<1x8x32xf32>
    tpu.vector_store %arg6[%c0_11, %c0_12, %c0_13], %17 {strides = array<i32>} : memref<1x8x32xf32, #tpu.memory_space<vmem>>, vector<1x8x32xf32>,
    return
  }
  func.func @transform_0(%arg0: i32, %arg1: i32) -> (i32, i32) {
    %c0_i32 = arith.constant 0 : i32
    %c0_i32_0 = arith.constant 0 : i32
    return %arg1, %c0_i32 : i32, i32
  }
  func.func @transform_1(%arg0: i32, %arg1: i32) -> (i32, i32, i32) {
    %c0_i32 = arith.constant 0 : i32
    %c0_i32_0 = arith.constant 0 : i32
    return %arg0, %arg1, %c0_i32 : i32, i32, i32
  }
  func.func @transform_2(%arg0: i32, %arg1: i32) -> (i32, i32, i32, i32) {
    %c0_i32 = arith.constant 0 : i32
    %c0_i32_0 = arith.constant 0 : i32
    %c0_i32_1 = arith.constant 0 : i32
    return %arg0, %arg1, %c0_i32, %c0_i32_0 : i32, i32, i32, i32
  }
  func.func @transform_3(%arg0: i32, %arg1: i32) -> (i32, i32, i32) {
    %c0_i32 = arith.constant 0 : i32
    %c0_i32_0 = arith.constant 0 : i32
    return %arg0, %arg1, %c0_i32 : i32, i32, i32
  }
  func.func @transform_4(%arg0: i32, %arg1: i32) -> (i32, i32, i32) {
    %c0_i32 = arith.constant 0 : i32
    %c0_i32_0 = arith.constant 0 : i32
    return %arg0, %arg1, %c0_i32 : i32, i32, i32
  }
}

module attributes {stable_mosaic.version = 11 : i64} {
  func.func @_linear_kernel(%arg0: i32, %arg1: memref<8x256xf32, #tpu.memory_space<vmem>>, %arg2: memref<256x32xbf16, #tpu.memory_space<vmem>>, %arg3: memref<1x32xf32, #tpu.memory_space<vmem>>, %arg4: memref<8x32xf32, #tpu.memory_space<vmem>>) attributes {dimension_semantics = [#tpu.dimension_semantics<parallel>], iteration_bounds = array<i64: 1>, scalar_prefetch = 0 : i64, scratch_operands = 0 : i64, tpu.core_type = #tpu.core_type<tc>, window_params = [{transform_indices = @transform_0, window_bounds = array<i64: 8, 256>}, {pipeline_mode = #tpu.pipeline_mode<synchronous>, transform_indices = @transform_1, window_bounds = array<i64: 256, 32>}, {pipeline_mode = #tpu.pipeline_mode<synchronous>, transform_indices = @transform_2, window_bounds = array<i64: 1, 32>}, {transform_indices = @transform_3, window_bounds = array<i64: 8, 32>}]} {
    %c0 = arith.constant 0 : index
    %c0_0 = arith.constant 0 : index
    %0 = vector.load %arg1[%c0, %c0_0] : memref<8x256xf32, #tpu.memory_space<vmem>>, vector<8x256xf32>
    %1 = arith.truncf %0 : vector<8x256xf32> to vector<8x256xbf16>
    %c0_1 = arith.constant 0 : index
    %c0_2 = arith.constant 0 : index
    %2 = vector.load %arg2[%c0_1, %c0_2] : memref<256x32xbf16, #tpu.memory_space<vmem>>, vector<256x32xbf16>
    %cst = arith.constant dense<0.000000e+00> : vector<8x32xf32>
    %3 = tpu.matmul %1, %2, %cst {dimension_numbers = #tpu.dot_dimension_numbers<[1], [0], [0], [1], [0, 0, 1, 1], [], []>} : vector<8x256xbf16>, vector<256x32xbf16>, vector<8x32xf32> -> vector<8x32xf32>
    %c0_3 = arith.constant 0 : index
    %c0_4 = arith.constant 0 : index
    %4 = vector.load %arg3[%c0_3, %c0_4] : memref<1x32xf32, #tpu.memory_space<vmem>>, vector<1x32xf32>
    %5 = vector.broadcast %4 : vector<1x32xf32> to vector<8x32xf32>
    %6 = arith.addf %3, %5 : vector<8x32xf32>
    %c0_5 = arith.constant 0 : index
    %c0_6 = arith.constant 0 : index
    %7 = vector.load %arg4[%c0_5, %c0_6] : memref<8x32xf32, #tpu.memory_space<vmem>>, vector<8x32xf32>
    tpu.vector_store %arg4[%c0_5, %c0_6], %6 {strides = array<i32>} : memref<8x32xf32, #tpu.memory_space<vmem>>, vector<8x32xf32>,
    return
  }
  func.func @transform_0(%arg0: i32) -> (i32, i32) {
    %c0_i32 = arith.constant 0 : i32
    %c0_i32_0 = arith.constant 0 : i32
    return %arg0, %c0_i32 : i32, i32
  }
  func.func @transform_1(%arg0: i32) -> (i32, i32) {
    %c0_i32 = arith.constant 0 : i32
    %c0_i32_0 = arith.constant 0 : i32
    %c0_i32_1 = arith.constant 0 : i32
    return %c0_i32, %c0_i32_0 : i32, i32
  }
  func.func @transform_2(%arg0: i32) -> (i32, i32) {
    %c0_i32 = arith.constant 0 : i32
    %c0_i32_0 = arith.constant 0 : i32
    %c0_i32_1 = arith.constant 0 : i32
    return %c0_i32, %c0_i32_0 : i32, i32
  }
  func.func @transform_3(%arg0: i32) -> (i32, i32) {
    %c0_i32 = arith.constant 0 : i32
    %c0_i32_0 = arith.constant 0 : i32
    return %arg0, %c0_i32 : i32, i32
  }
}

module attributes {stable_mosaic.version = 11 : i64} {
  func.func @_qkv_kernel(%arg0: i32, %arg1: memref<32x32xf32, #tpu.memory_space<vmem>>, %arg2: memref<32x32xbf16, #tpu.memory_space<vmem>>, %arg3: memref<1x32xf32, #tpu.memory_space<vmem>>, %arg4: memref<32x64xbf16, #tpu.memory_space<vmem>>, %arg5: memref<1x64xf32, #tpu.memory_space<vmem>>, %arg6: memref<32x32xbf16, #tpu.memory_space<vmem>>, %arg7: memref<32x64xbf16, #tpu.memory_space<vmem>>) attributes {dimension_semantics = [#tpu.dimension_semantics<parallel>], iteration_bounds = array<i64: 1>, scalar_prefetch = 0 : i64, scratch_operands = 0 : i64, tpu.core_type = #tpu.core_type<tc>, window_params = [{transform_indices = @transform_0, window_bounds = array<i64: 32, 32>}, {pipeline_mode = #tpu.pipeline_mode<synchronous>, transform_indices = @transform_1, window_bounds = array<i64: 32, 32>}, {pipeline_mode = #tpu.pipeline_mode<synchronous>, transform_indices = @transform_2, window_bounds = array<i64: 1, 32>}, {pipeline_mode = #tpu.pipeline_mode<synchronous>, transform_indices = @transform_3, window_bounds = array<i64: 32, 64>}, {pipeline_mode = #tpu.pipeline_mode<synchronous>, transform_indices = @transform_4, window_bounds = array<i64: 1, 64>}, {transform_indices = @transform_5, window_bounds = array<i64: 32, 32>}, {transform_indices = @transform_6, window_bounds = array<i64: 32, 64>}]} {
    %c0 = arith.constant 0 : index
    %c0_0 = arith.constant 0 : index
    %0 = vector.load %arg1[%c0, %c0_0] : memref<32x32xf32, #tpu.memory_space<vmem>>, vector<32x32xf32>
    %1 = arith.truncf %0 : vector<32x32xf32> to vector<32x32xbf16>
    %c0_1 = arith.constant 0 : index
    %c0_2 = arith.constant 0 : index
    %2 = vector.load %arg2[%c0_1, %c0_2] : memref<32x32xbf16, #tpu.memory_space<vmem>>, vector<32x32xbf16>
    %cst = arith.constant dense<0.000000e+00> : vector<32x32xf32>
    %3 = tpu.matmul %1, %2, %cst {dimension_numbers = #tpu.dot_dimension_numbers<[1], [0], [0], [1], [0, 0, 1, 1], [], []>} : vector<32x32xbf16>, vector<32x32xbf16>, vector<32x32xf32> -> vector<32x32xf32>
    %c0_3 = arith.constant 0 : index
    %c0_4 = arith.constant 0 : index
    %4 = vector.load %arg3[%c0_3, %c0_4] : memref<1x32xf32, #tpu.memory_space<vmem>>, vector<1x32xf32>
    %5 = vector.broadcast %4 : vector<1x32xf32> to vector<32x32xf32>
    %6 = arith.addf %3, %5 : vector<32x32xf32>
    %7 = arith.truncf %6 : vector<32x32xf32> to vector<32x32xbf16>
    %c0_5 = arith.constant 0 : index
    %c0_6 = arith.constant 0 : index
    %8 = vector.load %arg6[%c0_5, %c0_6] : memref<32x32xbf16, #tpu.memory_space<vmem>>, vector<32x32xbf16>
    tpu.vector_store %arg6[%c0_5, %c0_6], %7 {strides = array<i32>} : memref<32x32xbf16, #tpu.memory_space<vmem>>, vector<32x32xbf16>,
    %c0_7 = arith.constant 0 : index
    %c0_8 = arith.constant 0 : index
    %9 = vector.load %arg4[%c0_7, %c0_8] : memref<32x64xbf16, #tpu.memory_space<vmem>>, vector<32x64xbf16>
    %cst_9 = arith.constant dense<0.000000e+00> : vector<32x64xf32>
    %10 = tpu.matmul %1, %9, %cst_9 {dimension_numbers = #tpu.dot_dimension_numbers<[1], [0], [0], [1], [0, 0, 1, 1], [], []>} : vector<32x32xbf16>, vector<32x64xbf16>, vector<32x64xf32> -> vector<32x64xf32>
    %c0_10 = arith.constant 0 : index
    %c0_11 = arith.constant 0 : index
    %11 = vector.load %arg5[%c0_10, %c0_11] : memref<1x64xf32, #tpu.memory_space<vmem>>, vector<1x64xf32>
    %12 = vector.broadcast %11 : vector<1x64xf32> to vector<32x64xf32>
    %13 = arith.addf %10, %12 : vector<32x64xf32>
    %14 = arith.truncf %13 : vector<32x64xf32> to vector<32x64xbf16>
    %c0_12 = arith.constant 0 : index
    %c0_13 = arith.constant 0 : index
    %15 = vector.load %arg7[%c0_12, %c0_13] : memref<32x64xbf16, #tpu.memory_space<vmem>>, vector<32x64xbf16>
    tpu.vector_store %arg7[%c0_12, %c0_13], %14 {strides = array<i32>} : memref<32x64xbf16, #tpu.memory_space<vmem>>, vector<32x64xbf16>,
    return
  }
  func.func @transform_0(%arg0: i32) -> (i32, i32) {
    %c0_i32 = arith.constant 0 : i32
    %c0_i32_0 = arith.constant 0 : i32
    return %arg0, %c0_i32 : i32, i32
  }
  func.func @transform_1(%arg0: i32) -> (i32, i32) {
    %c0_i32 = arith.constant 0 : i32
    %c0_i32_0 = arith.constant 0 : i32
    %c0_i32_1 = arith.constant 0 : i32
    return %c0_i32, %c0_i32_0 : i32, i32
  }
  func.func @transform_2(%arg0: i32) -> (i32, i32) {
    %c0_i32 = arith.constant 0 : i32
    %c0_i32_0 = arith.constant 0 : i32
    %c0_i32_1 = arith.constant 0 : i32
    return %c0_i32, %c0_i32_0 : i32, i32
  }
  func.func @transform_3(%arg0: i32) -> (i32, i32) {
    %c0_i32 = arith.constant 0 : i32
    %c0_i32_0 = arith.constant 0 : i32
    %c0_i32_1 = arith.constant 0 : i32
    return %c0_i32, %c0_i32_0 : i32, i32
  }
  func.func @transform_4(%arg0: i32) -> (i32, i32) {
    %c0_i32 = arith.constant 0 : i32
    %c0_i32_0 = arith.constant 0 : i32
    %c0_i32_1 = arith.constant 0 : i32
    return %c0_i32, %c0_i32_0 : i32, i32
  }
  func.func @transform_5(%arg0: i32) -> (i32, i32) {
    %c0_i32 = arith.constant 0 : i32
    %c0_i32_0 = arith.constant 0 : i32
    return %arg0, %c0_i32 : i32, i32
  }
  func.func @transform_6(%arg0: i32) -> (i32, i32) {
    %c0_i32 = arith.constant 0 : i32
    %c0_i32_0 = arith.constant 0 : i32
    return %arg0, %c0_i32 : i32, i32
  }
}

module attributes {stable_mosaic.version = 11 : i64} {
  func.func @_attn_block_kernel(%arg0: i32, %arg1: i32, %arg2: memref<1x16x32xbf16, #tpu.memory_space<vmem>>, %arg3: memref<1x16x64xbf16, #tpu.memory_space<vmem>>, %arg4: memref<1x1x16xf32, #tpu.memory_space<vmem>>, %arg5: memref<1x16x32xf32, #tpu.memory_space<vmem>>, %arg6: memref<32x32xbf16, #tpu.memory_space<vmem>>, %arg7: memref<1x32xf32, #tpu.memory_space<vmem>>, %arg8: memref<1x32xf32, #tpu.memory_space<vmem>>, %arg9: memref<1x32xf32, #tpu.memory_space<vmem>>, %arg10: memref<1x16x32xf32, #tpu.memory_space<vmem>>) attributes {dimension_semantics = [#tpu.dimension_semantics<parallel>, #tpu.dimension_semantics<parallel>], iteration_bounds = array<i64: 2, 1>, scalar_prefetch = 0 : i64, scratch_operands = 0 : i64, tpu.core_type = #tpu.core_type<tc>, window_params = [{transform_indices = @transform_0, window_bounds = array<i64: 1, 16, 32>}, {pipeline_mode = #tpu.pipeline_mode<synchronous>, transform_indices = @transform_1, window_bounds = array<i64: 1, 16, 64>}, {transform_indices = @transform_2, window_bounds = array<i64: 1, 1, 16>}, {transform_indices = @transform_3, window_bounds = array<i64: 1, 16, 32>}, {pipeline_mode = #tpu.pipeline_mode<synchronous>, transform_indices = @transform_4, window_bounds = array<i64: 32, 32>}, {pipeline_mode = #tpu.pipeline_mode<synchronous>, transform_indices = @transform_5, window_bounds = array<i64: 1, 32>}, {pipeline_mode = #tpu.pipeline_mode<synchronous>, transform_indices = @transform_6, window_bounds = array<i64: 1, 32>}, {pipeline_mode = #tpu.pipeline_mode<synchronous>, transform_indices = @transform_7, window_bounds = array<i64: 1, 32>}, {transform_indices = @transform_8, window_bounds = array<i64: 1, 16, 32>}]} {
    %c0 = arith.constant 0 : index
    %c0_0 = arith.constant 0 : index
    %c0_1 = arith.constant 0 : index
    %0 = vector.load %arg2[%c0, %c0_0, %c0_1] : memref<1x16x32xbf16, #tpu.memory_space<vmem>>, vector<1x16x32xbf16>
    %1 = vector.shape_cast %0 : vector<1x16x32xbf16> to vector<16x32xbf16>
    %c0_2 = arith.constant 0 : index
    %c0_3 = arith.constant 0 : index
    %c0_4 = arith.constant 0 : index
    %2 = vector.load %arg3[%c0_2, %c0_3, %c0_4] : memref<1x16x64xbf16, #tpu.memory_space<vmem>>, vector<1x16x64xbf16>
    %3 = vector.shape_cast %2 : vector<1x16x64xbf16> to vector<16x64xbf16>
    %c0_5 = arith.constant 0 : index
    %c0_6 = arith.constant 0 : index
    %c0_7 = arith.constant 0 : index
    %4 = vector.load %arg4[%c0_5, %c0_6, %c0_7] : memref<1x1x16xf32, #tpu.memory_space<vmem>>, vector<1x1x16xf32>
    %5 = vector.shape_cast %4 : vector<1x1x16xf32> to vector<1x16xf32>
    %6 = vector.extract_strided_slice %1 {offsets = [0, 0], sizes = [16, 16], strides = [1, 1]} : vector<16x32xbf16> to vector<16x16xbf16>
    %7 = vector.extract_strided_slice %3 {offsets = [0, 0], sizes = [16, 16], strides = [1, 1]} : vector<16x64xbf16> to vector<16x16xbf16>
    %8 = vector.extract_strided_slice %3 {offsets = [0, 32], sizes = [16, 16], strides = [1, 1]} : vector<16x64xbf16> to vector<16x16xbf16>
    %cst = arith.constant dense<0.000000e+00> : vector<16x16xf32>
    %9 = tpu.matmul %6, %7, %cst {dimension_numbers = #tpu.dot_dimension_numbers<[1], [1], [0], [0], [0, 0, 1, 0], [], []>} : vector<16x16xbf16>, vector<16x16xbf16>, vector<16x16xf32> -> vector<16x16xf32>
    %cst_8 = arith.constant 2.500000e-01 : f32
    %10 = vector.broadcast %cst_8 : f32 to vector<16x16xf32>
    %11 = arith.mulf %9, %10 : vector<16x16xf32>
    %12 = vector.broadcast %5 : vector<1x16xf32> to vector<16x16xf32>
    %13 = arith.addf %11, %12 : vector<16x16xf32>
    %cst_9 = arith.constant dense<0xFF800000> : vector<16xf32>
    %14 = vector.multi_reduction <maximumf>, %13, %cst_9 [1] : vector<16x16xf32> to vector<16xf32>
    %15 = vector.shape_cast %14 : vector<16xf32> to vector<16x1xf32>
    %16 = vector.broadcast %15 : vector<16x1xf32> to vector<16x16xf32>
    %17 = arith.subf %13, %16 : vector<16x16xf32>
    %18 = math.exp %17 : vector<16x16xf32>
    %cst_10 = arith.constant dense<0.000000e+00> : vector<16xf32>
    %19 = vector.multi_reduction <add>, %18, %cst_10 [1] : vector<16x16xf32> to vector<16xf32>
    %20 = vector.shape_cast %19 : vector<16xf32> to vector<16x1xf32>
    %21 = tpu.reciprocal %20 {approx = true} : vector<16x1xf32> -> vector<16x1xf32>
    %22 = vector.broadcast %21 : vector<16x1xf32> to vector<16x16xf32>
    %23 = arith.mulf %18, %22 : vector<16x16xf32>
    %24 = arith.truncf %23 : vector<16x16xf32> to vector<16x16xbf16>
    %cst_11 = arith.constant dense<0.000000e+00> : vector<16x16xf32>
    %25 = tpu.matmul %24, %8, %cst_11 {dimension_numbers = #tpu.dot_dimension_numbers<[1], [0], [0], [1], [0, 0, 1, 1], [], []>} : vector<16x16xbf16>, vector<16x16xbf16>, vector<16x16xf32> -> vector<16x16xf32>
    %26 = vector.extract_strided_slice %1 {offsets = [0, 16], sizes = [16, 16], strides = [1, 1]} : vector<16x32xbf16> to vector<16x16xbf16>
    %27 = vector.extract_strided_slice %3 {offsets = [0, 16], sizes = [16, 16], strides = [1, 1]} : vector<16x64xbf16> to vector<16x16xbf16>
    %28 = vector.extract_strided_slice %3 {offsets = [0, 48], sizes = [16, 16], strides = [1, 1]} : vector<16x64xbf16> to vector<16x16xbf16>
    %cst_12 = arith.constant dense<0.000000e+00> : vector<16x16xf32>
    %29 = tpu.matmul %26, %27, %cst_12 {dimension_numbers = #tpu.dot_dimension_numbers<[1], [1], [0], [0], [0, 0, 1, 0], [], []>} : vector<16x16xbf16>, vector<16x16xbf16>, vector<16x16xf32> -> vector<16x16xf32>
    %cst_13 = arith.constant 2.500000e-01 : f32
    %30 = vector.broadcast %cst_13 : f32 to vector<16x16xf32>
    %31 = arith.mulf %29, %30 : vector<16x16xf32>
    %32 = vector.broadcast %5 : vector<1x16xf32> to vector<16x16xf32>
    %33 = arith.addf %31, %32 : vector<16x16xf32>
    %cst_14 = arith.constant dense<0xFF800000> : vector<16xf32>
    %34 = vector.multi_reduction <maximumf>, %33, %cst_14 [1] : vector<16x16xf32> to vector<16xf32>
    %35 = vector.shape_cast %34 : vector<16xf32> to vector<16x1xf32>
    %36 = vector.broadcast %35 : vector<16x1xf32> to vector<16x16xf32>
    %37 = arith.subf %33, %36 : vector<16x16xf32>
    %38 = math.exp %37 : vector<16x16xf32>
    %cst_15 = arith.constant dense<0.000000e+00> : vector<16xf32>
    %39 = vector.multi_reduction <add>, %38, %cst_15 [1] : vector<16x16xf32> to vector<16xf32>
    %40 = vector.shape_cast %39 : vector<16xf32> to vector<16x1xf32>
    %41 = tpu.reciprocal %40 {approx = true} : vector<16x1xf32> -> vector<16x1xf32>
    %42 = vector.broadcast %41 : vector<16x1xf32> to vector<16x16xf32>
    %43 = arith.mulf %38, %42 : vector<16x16xf32>
    %44 = arith.truncf %43 : vector<16x16xf32> to vector<16x16xbf16>
    %cst_16 = arith.constant dense<0.000000e+00> : vector<16x16xf32>
    %45 = tpu.matmul %44, %28, %cst_16 {dimension_numbers = #tpu.dot_dimension_numbers<[1], [0], [0], [1], [0, 0, 1, 1], [], []>} : vector<16x16xbf16>, vector<16x16xbf16>, vector<16x16xf32> -> vector<16x16xf32>
    %46 = tpu.concatenate %25, %45 in 1 : vector<16x16xf32>, vector<16x16xf32> -> vector<16x32xf32>
    %47 = arith.truncf %46 : vector<16x32xf32> to vector<16x32xbf16>
    %c0_17 = arith.constant 0 : index
    %c0_18 = arith.constant 0 : index
    %48 = vector.load %arg6[%c0_17, %c0_18] : memref<32x32xbf16, #tpu.memory_space<vmem>>, vector<32x32xbf16>
    %cst_19 = arith.constant dense<0.000000e+00> : vector<16x32xf32>
    %49 = tpu.matmul %47, %48, %cst_19 {dimension_numbers = #tpu.dot_dimension_numbers<[1], [0], [0], [1], [0, 0, 1, 1], [], []>} : vector<16x32xbf16>, vector<32x32xbf16>, vector<16x32xf32> -> vector<16x32xf32>
    %c0_20 = arith.constant 0 : index
    %c0_21 = arith.constant 0 : index
    %50 = vector.load %arg7[%c0_20, %c0_21] : memref<1x32xf32, #tpu.memory_space<vmem>>, vector<1x32xf32>
    %51 = vector.broadcast %50 : vector<1x32xf32> to vector<16x32xf32>
    %52 = arith.addf %49, %51 : vector<16x32xf32>
    %c0_22 = arith.constant 0 : index
    %c0_23 = arith.constant 0 : index
    %c0_24 = arith.constant 0 : index
    %53 = vector.load %arg5[%c0_22, %c0_23, %c0_24] : memref<1x16x32xf32, #tpu.memory_space<vmem>>, vector<1x16x32xf32>
    %54 = vector.shape_cast %53 : vector<1x16x32xf32> to vector<16x32xf32>
    %55 = arith.addf %54, %52 : vector<16x32xf32>
    %cst_25 = arith.constant dense<0.000000e+00> : vector<16xf32>
    %56 = vector.multi_reduction <add>, %55, %cst_25 [1] : vector<16x32xf32> to vector<16xf32>
    %57 = vector.shape_cast %56 : vector<16xf32> to vector<16x1xf32>
    %cst_26 = arith.constant 3.200000e+01 : f32
    %58 = vector.broadcast %cst_26 : f32 to vector<16x1xf32>
    %59 = arith.divf %57, %58 : vector<16x1xf32>
    %60 = vector.broadcast %59 : vector<16x1xf32> to vector<16x32xf32>
    %61 = arith.subf %55, %60 : vector<16x32xf32>
    %62 = arith.mulf %61, %61 : vector<16x32xf32>
    %cst_27 = arith.constant dense<0.000000e+00> : vector<16xf32>
    %63 = vector.multi_reduction <add>, %62, %cst_27 [1] : vector<16x32xf32> to vector<16xf32>
    %64 = vector.shape_cast %63 : vector<16xf32> to vector<16x1xf32>
    %cst_28 = arith.constant 3.200000e+01 : f32
    %65 = vector.broadcast %cst_28 : f32 to vector<16x1xf32>
    %66 = arith.divf %64, %65 : vector<16x1xf32>
    %67 = vector.broadcast %59 : vector<16x1xf32> to vector<16x32xf32>
    %68 = arith.subf %55, %67 : vector<16x32xf32>
    %cst_29 = arith.constant 9.99999974E-6 : f32
    %69 = vector.broadcast %cst_29 : f32 to vector<16x1xf32>
    %70 = arith.addf %66, %69 : vector<16x1xf32>
    %71 = math.rsqrt %70 : vector<16x1xf32>
    %72 = vector.broadcast %71 : vector<16x1xf32> to vector<16x32xf32>
    %73 = arith.mulf %68, %72 : vector<16x32xf32>
    %c0_30 = arith.constant 0 : index
    %c0_31 = arith.constant 0 : index
    %74 = vector.load %arg8[%c0_30, %c0_31] : memref<1x32xf32, #tpu.memory_space<vmem>>, vector<1x32xf32>
    %75 = vector.broadcast %74 : vector<1x32xf32> to vector<16x32xf32>
    %76 = arith.mulf %73, %75 : vector<16x32xf32>
    %c0_32 = arith.constant 0 : index
    %c0_33 = arith.constant 0 : index
    %77 = vector.load %arg9[%c0_32, %c0_33] : memref<1x32xf32, #tpu.memory_space<vmem>>, vector<1x32xf32>
    %78 = vector.broadcast %77 : vector<1x32xf32> to vector<16x32xf32>
    %79 = arith.addf %76, %78 : vector<16x32xf32>
    %c0_34 = arith.constant 0 : index
    %c0_35 = arith.constant 0 : index
    %c0_36 = arith.constant 0 : index
    %80 = vector.load %arg10[%c0_34, %c0_35, %c0_36] : memref<1x16x32xf32, #tpu.memory_space<vmem>>, vector<1x16x32xf32>
    %81 = vector.shape_cast %80 : vector<1x16x32xf32> to vector<16x32xf32>
    %82 = vector.shape_cast %79 : vector<16x32xf32> to vector<1x16x32xf32>
    tpu.vector_store %arg10[%c0_34, %c0_35, %c0_36], %82 {strides = array<i32>} : memref<1x16x32xf32, #tpu.memory_space<vmem>>, vector<1x16x32xf32>,
    return
  }
  func.func @transform_0(%arg0: i32, %arg1: i32) -> (i32, i32, i32) {
    %c0_i32 = arith.constant 0 : i32
    %c0_i32_0 = arith.constant 0 : i32
    return %arg0, %arg1, %c0_i32 : i32, i32, i32
  }
  func.func @transform_1(%arg0: i32, %arg1: i32) -> (i32, i32, i32) {
    %c0_i32 = arith.constant 0 : i32
    %c0_i32_0 = arith.constant 0 : i32
    %c0_i32_1 = arith.constant 0 : i32
    return %arg0, %c0_i32, %c0_i32_0 : i32, i32, i32
  }
  func.func @transform_2(%arg0: i32, %arg1: i32) -> (i32, i32, i32) {
    %c0_i32 = arith.constant 0 : i32
    %c0_i32_0 = arith.constant 0 : i32
    %c0_i32_1 = arith.constant 0 : i32
    return %arg0, %c0_i32, %c0_i32_0 : i32, i32, i32
  }
  func.func @transform_3(%arg0: i32, %arg1: i32) -> (i32, i32, i32) {
    %c0_i32 = arith.constant 0 : i32
    %c0_i32_0 = arith.constant 0 : i32
    return %arg0, %arg1, %c0_i32 : i32, i32, i32
  }
  func.func @transform_4(%arg0: i32, %arg1: i32) -> (i32, i32) {
    %c0_i32 = arith.constant 0 : i32
    %c0_i32_0 = arith.constant 0 : i32
    %c0_i32_1 = arith.constant 0 : i32
    return %c0_i32, %c0_i32_0 : i32, i32
  }
  func.func @transform_5(%arg0: i32, %arg1: i32) -> (i32, i32) {
    %c0_i32 = arith.constant 0 : i32
    %c0_i32_0 = arith.constant 0 : i32
    %c0_i32_1 = arith.constant 0 : i32
    return %c0_i32, %c0_i32_0 : i32, i32
  }
  func.func @transform_6(%arg0: i32, %arg1: i32) -> (i32, i32) {
    %c0_i32 = arith.constant 0 : i32
    %c0_i32_0 = arith.constant 0 : i32
    %c0_i32_1 = arith.constant 0 : i32
    return %c0_i32, %c0_i32_0 : i32, i32
  }
  func.func @transform_7(%arg0: i32, %arg1: i32) -> (i32, i32) {
    %c0_i32 = arith.constant 0 : i32
    %c0_i32_0 = arith.constant 0 : i32
    %c0_i32_1 = arith.constant 0 : i32
    return %c0_i32, %c0_i32_0 : i32, i32
  }
  func.func @transform_8(%arg0: i32, %arg1: i32) -> (i32, i32, i32) {
    %c0_i32 = arith.constant 0 : i32
    %c0_i32_0 = arith.constant 0 : i32
    return %arg0, %arg1, %c0_i32 : i32, i32, i32
  }
}

module attributes {stable_mosaic.version = 11 : i64} {
  func.func @_ffn_ln_kernel(%arg0: i32, %arg1: memref<32x32xf32, #tpu.memory_space<vmem>>, %arg2: memref<32x64xbf16, #tpu.memory_space<vmem>>, %arg3: memref<1x64xf32, #tpu.memory_space<vmem>>, %arg4: memref<64x32xbf16, #tpu.memory_space<vmem>>, %arg5: memref<1x32xf32, #tpu.memory_space<vmem>>, %arg6: memref<1x32xf32, #tpu.memory_space<vmem>>, %arg7: memref<1x32xf32, #tpu.memory_space<vmem>>, %arg8: memref<32x32xf32, #tpu.memory_space<vmem>>) attributes {dimension_semantics = [#tpu.dimension_semantics<parallel>], iteration_bounds = array<i64: 1>, scalar_prefetch = 0 : i64, scratch_operands = 0 : i64, tpu.core_type = #tpu.core_type<tc>, window_params = [{transform_indices = @transform_0, window_bounds = array<i64: 32, 32>}, {pipeline_mode = #tpu.pipeline_mode<synchronous>, transform_indices = @transform_1, window_bounds = array<i64: 32, 64>}, {pipeline_mode = #tpu.pipeline_mode<synchronous>, transform_indices = @transform_2, window_bounds = array<i64: 1, 64>}, {pipeline_mode = #tpu.pipeline_mode<synchronous>, transform_indices = @transform_3, window_bounds = array<i64: 64, 32>}, {pipeline_mode = #tpu.pipeline_mode<synchronous>, transform_indices = @transform_4, window_bounds = array<i64: 1, 32>}, {pipeline_mode = #tpu.pipeline_mode<synchronous>, transform_indices = @transform_5, window_bounds = array<i64: 1, 32>}, {pipeline_mode = #tpu.pipeline_mode<synchronous>, transform_indices = @transform_6, window_bounds = array<i64: 1, 32>}, {transform_indices = @transform_7, window_bounds = array<i64: 32, 32>}]} {
    %c0 = arith.constant 0 : index
    %c0_0 = arith.constant 0 : index
    %0 = vector.load %arg1[%c0, %c0_0] : memref<32x32xf32, #tpu.memory_space<vmem>>, vector<32x32xf32>
    %1 = arith.truncf %0 : vector<32x32xf32> to vector<32x32xbf16>
    %c0_1 = arith.constant 0 : index
    %c0_2 = arith.constant 0 : index
    %2 = vector.load %arg2[%c0_1, %c0_2] : memref<32x64xbf16, #tpu.memory_space<vmem>>, vector<32x64xbf16>
    %cst = arith.constant dense<0.000000e+00> : vector<32x64xf32>
    %3 = tpu.matmul %1, %2, %cst {dimension_numbers = #tpu.dot_dimension_numbers<[1], [0], [0], [1], [0, 0, 1, 1], [], []>} : vector<32x32xbf16>, vector<32x64xbf16>, vector<32x64xf32> -> vector<32x64xf32>
    %c0_3 = arith.constant 0 : index
    %c0_4 = arith.constant 0 : index
    %4 = vector.load %arg3[%c0_3, %c0_4] : memref<1x64xf32, #tpu.memory_space<vmem>>, vector<1x64xf32>
    %5 = vector.broadcast %4 : vector<1x64xf32> to vector<32x64xf32>
    %6 = arith.addf %3, %5 : vector<32x64xf32>
    %cst_5 = arith.constant 0.000000e+00 : f32
    %7 = vector.broadcast %cst_5 : f32 to vector<32x64xf32>
    %8 = arith.maximumf %6, %7 : vector<32x64xf32>
    %9 = arith.truncf %8 : vector<32x64xf32> to vector<32x64xbf16>
    %c0_6 = arith.constant 0 : index
    %c0_7 = arith.constant 0 : index
    %10 = vector.load %arg4[%c0_6, %c0_7] : memref<64x32xbf16, #tpu.memory_space<vmem>>, vector<64x32xbf16>
    %cst_8 = arith.constant dense<0.000000e+00> : vector<32x32xf32>
    %11 = tpu.matmul %9, %10, %cst_8 {dimension_numbers = #tpu.dot_dimension_numbers<[1], [0], [0], [1], [0, 0, 1, 1], [], []>} : vector<32x64xbf16>, vector<64x32xbf16>, vector<32x32xf32> -> vector<32x32xf32>
    %c0_9 = arith.constant 0 : index
    %c0_10 = arith.constant 0 : index
    %12 = vector.load %arg5[%c0_9, %c0_10] : memref<1x32xf32, #tpu.memory_space<vmem>>, vector<1x32xf32>
    %13 = vector.broadcast %12 : vector<1x32xf32> to vector<32x32xf32>
    %14 = arith.addf %11, %13 : vector<32x32xf32>
    %15 = arith.addf %0, %14 : vector<32x32xf32>
    %cst_11 = arith.constant dense<0.000000e+00> : vector<32xf32>
    %16 = vector.multi_reduction <add>, %15, %cst_11 [1] : vector<32x32xf32> to vector<32xf32>
    %17 = vector.shape_cast %16 : vector<32xf32> to vector<32x1xf32>
    %cst_12 = arith.constant 3.200000e+01 : f32
    %18 = vector.broadcast %cst_12 : f32 to vector<32x1xf32>
    %19 = arith.divf %17, %18 : vector<32x1xf32>
    %20 = vector.broadcast %19 : vector<32x1xf32> to vector<32x32xf32>
    %21 = arith.subf %15, %20 : vector<32x32xf32>
    %22 = arith.mulf %21, %21 : vector<32x32xf32>
    %cst_13 = arith.constant dense<0.000000e+00> : vector<32xf32>
    %23 = vector.multi_reduction <add>, %22, %cst_13 [1] : vector<32x32xf32> to vector<32xf32>
    %24 = vector.shape_cast %23 : vector<32xf32> to vector<32x1xf32>
    %cst_14 = arith.constant 3.200000e+01 : f32
    %25 = vector.broadcast %cst_14 : f32 to vector<32x1xf32>
    %26 = arith.divf %24, %25 : vector<32x1xf32>
    %27 = vector.broadcast %19 : vector<32x1xf32> to vector<32x32xf32>
    %28 = arith.subf %15, %27 : vector<32x32xf32>
    %cst_15 = arith.constant 9.99999974E-6 : f32
    %29 = vector.broadcast %cst_15 : f32 to vector<32x1xf32>
    %30 = arith.addf %26, %29 : vector<32x1xf32>
    %31 = math.rsqrt %30 : vector<32x1xf32>
    %32 = vector.broadcast %31 : vector<32x1xf32> to vector<32x32xf32>
    %33 = arith.mulf %28, %32 : vector<32x32xf32>
    %c0_16 = arith.constant 0 : index
    %c0_17 = arith.constant 0 : index
    %34 = vector.load %arg6[%c0_16, %c0_17] : memref<1x32xf32, #tpu.memory_space<vmem>>, vector<1x32xf32>
    %35 = vector.broadcast %34 : vector<1x32xf32> to vector<32x32xf32>
    %36 = arith.mulf %33, %35 : vector<32x32xf32>
    %c0_18 = arith.constant 0 : index
    %c0_19 = arith.constant 0 : index
    %37 = vector.load %arg7[%c0_18, %c0_19] : memref<1x32xf32, #tpu.memory_space<vmem>>, vector<1x32xf32>
    %38 = vector.broadcast %37 : vector<1x32xf32> to vector<32x32xf32>
    %39 = arith.addf %36, %38 : vector<32x32xf32>
    %c0_20 = arith.constant 0 : index
    %c0_21 = arith.constant 0 : index
    %40 = vector.load %arg8[%c0_20, %c0_21] : memref<32x32xf32, #tpu.memory_space<vmem>>, vector<32x32xf32>
    tpu.vector_store %arg8[%c0_20, %c0_21], %39 {strides = array<i32>} : memref<32x32xf32, #tpu.memory_space<vmem>>, vector<32x32xf32>,
    return
  }
  func.func @transform_0(%arg0: i32) -> (i32, i32) {
    %c0_i32 = arith.constant 0 : i32
    %c0_i32_0 = arith.constant 0 : i32
    return %arg0, %c0_i32 : i32, i32
  }
  func.func @transform_1(%arg0: i32) -> (i32, i32) {
    %c0_i32 = arith.constant 0 : i32
    %c0_i32_0 = arith.constant 0 : i32
    %c0_i32_1 = arith.constant 0 : i32
    return %c0_i32, %c0_i32_0 : i32, i32
  }
  func.func @transform_2(%arg0: i32) -> (i32, i32) {
    %c0_i32 = arith.constant 0 : i32
    %c0_i32_0 = arith.constant 0 : i32
    %c0_i32_1 = arith.constant 0 : i32
    return %c0_i32, %c0_i32_0 : i32, i32
  }
  func.func @transform_3(%arg0: i32) -> (i32, i32) {
    %c0_i32 = arith.constant 0 : i32
    %c0_i32_0 = arith.constant 0 : i32
    %c0_i32_1 = arith.constant 0 : i32
    return %c0_i32, %c0_i32_0 : i32, i32
  }
  func.func @transform_4(%arg0: i32) -> (i32, i32) {
    %c0_i32 = arith.constant 0 : i32
    %c0_i32_0 = arith.constant 0 : i32
    %c0_i32_1 = arith.constant 0 : i32
    return %c0_i32, %c0_i32_0 : i32, i32
  }
  func.func @transform_5(%arg0: i32) -> (i32, i32) {
    %c0_i32 = arith.constant 0 : i32
    %c0_i32_0 = arith.constant 0 : i32
    %c0_i32_1 = arith.constant 0 : i32
    return %c0_i32, %c0_i32_0 : i32, i32
  }
  func.func @transform_6(%arg0: i32) -> (i32, i32) {
    %c0_i32 = arith.constant 0 : i32
    %c0_i32_0 = arith.constant 0 : i32
    %c0_i32_1 = arith.constant 0 : i32
    return %c0_i32, %c0_i32_0 : i32, i32
  }
  func.func @transform_7(%arg0: i32) -> (i32, i32) {
    %c0_i32 = arith.constant 0 : i32
    %c0_i32_0 = arith.constant 0 : i32
    return %arg0, %c0_i32 : i32, i32
  }
}

module attributes {stable_mosaic.version = 11 : i64} {
  func.func @_ln_head_kernel(%arg0: i32, %arg1: memref<32x32xf32, #tpu.memory_space<vmem>>, %arg2: memref<1x32xf32, #tpu.memory_space<vmem>>, %arg3: memref<1x32xf32, #tpu.memory_space<vmem>>, %arg4: memref<32x4xbf16, #tpu.memory_space<vmem>>, %arg5: memref<1x4xf32, #tpu.memory_space<vmem>>, %arg6: memref<32x4xf32, #tpu.memory_space<vmem>>) attributes {dimension_semantics = [#tpu.dimension_semantics<parallel>], iteration_bounds = array<i64: 1>, scalar_prefetch = 0 : i64, scratch_operands = 0 : i64, tpu.core_type = #tpu.core_type<tc>, window_params = [{transform_indices = @transform_0, window_bounds = array<i64: 32, 32>}, {pipeline_mode = #tpu.pipeline_mode<synchronous>, transform_indices = @transform_1, window_bounds = array<i64: 1, 32>}, {pipeline_mode = #tpu.pipeline_mode<synchronous>, transform_indices = @transform_2, window_bounds = array<i64: 1, 32>}, {pipeline_mode = #tpu.pipeline_mode<synchronous>, transform_indices = @transform_3, window_bounds = array<i64: 32, 4>}, {pipeline_mode = #tpu.pipeline_mode<synchronous>, transform_indices = @transform_4, window_bounds = array<i64: 1, 4>}, {transform_indices = @transform_5, window_bounds = array<i64: 32, 4>}]} {
    %c0 = arith.constant 0 : index
    %c0_0 = arith.constant 0 : index
    %0 = vector.load %arg1[%c0, %c0_0] : memref<32x32xf32, #tpu.memory_space<vmem>>, vector<32x32xf32>
    %cst = arith.constant dense<0.000000e+00> : vector<32xf32>
    %1 = vector.multi_reduction <add>, %0, %cst [1] : vector<32x32xf32> to vector<32xf32>
    %2 = vector.shape_cast %1 : vector<32xf32> to vector<32x1xf32>
    %cst_1 = arith.constant 3.200000e+01 : f32
    %3 = vector.broadcast %cst_1 : f32 to vector<32x1xf32>
    %4 = arith.divf %2, %3 : vector<32x1xf32>
    %5 = vector.broadcast %4 : vector<32x1xf32> to vector<32x32xf32>
    %6 = arith.subf %0, %5 : vector<32x32xf32>
    %7 = arith.mulf %6, %6 : vector<32x32xf32>
    %cst_2 = arith.constant dense<0.000000e+00> : vector<32xf32>
    %8 = vector.multi_reduction <add>, %7, %cst_2 [1] : vector<32x32xf32> to vector<32xf32>
    %9 = vector.shape_cast %8 : vector<32xf32> to vector<32x1xf32>
    %cst_3 = arith.constant 3.200000e+01 : f32
    %10 = vector.broadcast %cst_3 : f32 to vector<32x1xf32>
    %11 = arith.divf %9, %10 : vector<32x1xf32>
    %12 = vector.broadcast %4 : vector<32x1xf32> to vector<32x32xf32>
    %13 = arith.subf %0, %12 : vector<32x32xf32>
    %cst_4 = arith.constant 9.99999974E-6 : f32
    %14 = vector.broadcast %cst_4 : f32 to vector<32x1xf32>
    %15 = arith.addf %11, %14 : vector<32x1xf32>
    %16 = math.rsqrt %15 : vector<32x1xf32>
    %17 = vector.broadcast %16 : vector<32x1xf32> to vector<32x32xf32>
    %18 = arith.mulf %13, %17 : vector<32x32xf32>
    %c0_5 = arith.constant 0 : index
    %c0_6 = arith.constant 0 : index
    %19 = vector.load %arg2[%c0_5, %c0_6] : memref<1x32xf32, #tpu.memory_space<vmem>>, vector<1x32xf32>
    %20 = vector.broadcast %19 : vector<1x32xf32> to vector<32x32xf32>
    %21 = arith.mulf %18, %20 : vector<32x32xf32>
    %c0_7 = arith.constant 0 : index
    %c0_8 = arith.constant 0 : index
    %22 = vector.load %arg3[%c0_7, %c0_8] : memref<1x32xf32, #tpu.memory_space<vmem>>, vector<1x32xf32>
    %23 = vector.broadcast %22 : vector<1x32xf32> to vector<32x32xf32>
    %24 = arith.addf %21, %23 : vector<32x32xf32>
    %25 = arith.truncf %24 : vector<32x32xf32> to vector<32x32xbf16>
    %c0_9 = arith.constant 0 : index
    %c0_10 = arith.constant 0 : index
    %26 = vector.load %arg4[%c0_9, %c0_10] : memref<32x4xbf16, #tpu.memory_space<vmem>>, vector<32x4xbf16>
    %cst_11 = arith.constant dense<0.000000e+00> : vector<32x4xf32>
    %27 = tpu.matmul %25, %26, %cst_11 {dimension_numbers = #tpu.dot_dimension_numbers<[1], [0], [0], [1], [0, 0, 1, 1], [], []>} : vector<32x32xbf16>, vector<32x4xbf16>, vector<32x4xf32> -> vector<32x4xf32>
    %c0_12 = arith.constant 0 : index
    %c0_13 = arith.constant 0 : index
    %28 = vector.load %arg5[%c0_12, %c0_13] : memref<1x4xf32, #tpu.memory_space<vmem>>, vector<1x4xf32>
    %29 = vector.broadcast %28 : vector<1x4xf32> to vector<32x4xf32>
    %30 = arith.addf %27, %29 : vector<32x4xf32>
    %c0_14 = arith.constant 0 : index
    %c0_15 = arith.constant 0 : index
    %31 = vector.load %arg6[%c0_14, %c0_15] : memref<32x4xf32, #tpu.memory_space<vmem>>, vector<32x4xf32>
    tpu.vector_store %arg6[%c0_14, %c0_15], %30 {strides = array<i32>} : memref<32x4xf32, #tpu.memory_space<vmem>>, vector<32x4xf32>,
    return
  }
  func.func @transform_0(%arg0: i32) -> (i32, i32) {
    %c0_i32 = arith.constant 0 : i32
    %c0_i32_0 = arith.constant 0 : i32
    return %arg0, %c0_i32 : i32, i32
  }
  func.func @transform_1(%arg0: i32) -> (i32, i32) {
    %c0_i32 = arith.constant 0 : i32
    %c0_i32_0 = arith.constant 0 : i32
    %c0_i32_1 = arith.constant 0 : i32
    return %c0_i32, %c0_i32_0 : i32, i32
  }
  func.func @transform_2(%arg0: i32) -> (i32, i32) {
    %c0_i32 = arith.constant 0 : i32
    %c0_i32_0 = arith.constant 0 : i32
    %c0_i32_1 = arith.constant 0 : i32
    return %c0_i32, %c0_i32_0 : i32, i32
  }
  func.func @transform_3(%arg0: i32) -> (i32, i32) {
    %c0_i32 = arith.constant 0 : i32
    %c0_i32_0 = arith.constant 0 : i32
    %c0_i32_1 = arith.constant 0 : i32
    return %c0_i32, %c0_i32_0 : i32, i32
  }
  func.func @transform_4(%arg0: i32) -> (i32, i32) {
    %c0_i32 = arith.constant 0 : i32
    %c0_i32_0 = arith.constant 0 : i32
    %c0_i32_1 = arith.constant 0 : i32
    return %c0_i32, %c0_i32_0 : i32, i32
  }
  func.func @transform_5(%arg0: i32) -> (i32, i32) {
    %c0_i32 = arith.constant 0 : i32
    %c0_i32_0 = arith.constant 0 : i32
    return %arg0, %c0_i32 : i32, i32
  }
}

</mosaic_0001>

<bundles_post_ra>
// kernel: _ptsm_apply.10
= control target key start
LH: loop header
LB: loop body
LE: loop exit
PB: predicated region body
PF: predicated region fallthrough
CT: control target
= control target key end

     0   :  { %vm36_vm0 = vcmask 1041408   ;;  %v103_v3 = vmov 0   ;;  %vm29_vm1 = vcmask 31744   ;;  %vm87_vm2 = vcmask 261120   ;;  %s171_s1 = inlined_call_operand.vmem [shape: bf16[4,32], index: 1, kind: input, shape index: {}]   ;;  %s172_s0 = inlined_call_operand.vmem [shape: f32[32,4], index: 0, kind: input, shape index: {}]   ;;  %s173_s3 = inlined_call_operand.vmem [shape: f32[32,1], index: 3, kind: input, shape index: {}]   ;;  %s174_s2 = inlined_call_operand.vmem [shape: f32[1,32], index: 2, kind: input, shape index: {}]   ;;  %s175_s4 = inlined_call_operand.vmem [shape: f32[32,32], index: 4, kind: output, shape index: {}]  }
   0x1   :  { %v24_v0 = vld [vmem:[%s171_s1] sm:$0x3]  ;;  %v19_v2 = vld [vmem:[%s172_s0 + $0x8] sm:$0xff]  ;;  %101 = vset.pattern.permute.xlu1 %v103_v3  ;;  %100 = vset.pattern.permute.xlu0 %v103_v3  ;;  %v20_v6 = vld [vmem:[%s172_s0 + $0x10] sm:$0xff] }
   0x2   :  { %v18_v1 = vld [vmem:[%s172_s0] sm:$0xff]  ;;  %v38_v4 = vsel %vm36_vm0, %v24_v0, 0  ;;  %v21_v7 = vld [vmem:[%s172_s0 + $0x18] sm:$0xff]  ;;  %v61_v8 = vld [vmem:[%s173_s3 + $0x10] sm:$0xff] }
   0x3   :  { %v22_v5 = vpack.c.bf16 %v19_v2, %v18_v1  ;;  %47 = vmatpush.bf16.msra.mxu0 %v38_v4  ;;  %98 = vmatpush.bf16.msra.mxu1 %v38_v4  ;;  %v23_v9 = vpack.c.bf16 %v21_v7, %v20_v6  ;;  %v59_v10 = vld [vmem:[%s173_s3] sm:$0xff]  ;;  %v62_v11 = vld [vmem:[%s173_s3 + $0x18] sm:$0xff]  ;;  %v60_v12 = vld [vmem:[%s173_s3 + $0x8] sm:$0xff] }
   0x4   :  { %75 = vperm.xlu1 %101, %v61_v8   ;;  %65 = vperm.xlu0 %100, %v59_v10   ;;  %v102_v13 = vld [vmem:[%s174_s2] ss:$0 sm:$0xff] }
   0x6   :  { %96 = vmatmul.msk.bf16.vlgmr.msra.gmra.mxu0 %vm29_vm1, %v22_v5  ;;  %97 = vmatmul.msk.bf16.vlgmr.msra.gmra.mxu1 %vm29_vm1, %v23_v9 }
   0xc   :  { %80 = vperm.xlu1 %101, %v62_v11   ;;  %70 = vperm.xlu0 %100, %v60_v12  }
  0x76   :  { %v76_v14 = vpop.permute.xlu1 %75  ;;  %v66_v15 = vpop.permute.xlu0 %65 }
  0x7e   :  { %v81_v26 = vpop.permute.xlu1 %80  ;;  %v71_v27 = vpop.permute.xlu0 %70 }
  0x83   :  { %v49_v16 = vpop.f32.mrf.mxu0  ;;  %v54_v17 = vpop.f32.mrf.mxu1 }
  0x84   :  { %v50_v18 = vadd.f32 %v102_v13, %v49_v16  ;;  %v55_v19 = vadd.f32 %v102_v13, %v54_v17 }
  0x86   :  { %v83_v20 = vmul.f32 %v66_v15, %v50_v18  ;;  %v85_v21 = vmul.f32 %v76_v14, %v55_v19 }
  0x88   :  { %88 = vst.msk [vmem:[%s175_s4] sm:$0xff] %vm87_vm2, %v83_v20 }
  0x89   :  { %90 = vst.msk [vmem:[%s175_s4 + $0x10] sm:$0xff] %vm87_vm2, %v85_v21 }
  0x8b   :  { %v51_v22 = vpop.f32.mrf.mxu0  ;;  %v56_v23 = vpop.f32.mrf.mxu1 }
  0x8c   :  { %v52_v24 = vadd.f32 %v102_v13, %v51_v22  ;;  %v57_v25 = vadd.f32 %v102_v13, %v56_v23 }
  0x8e   :  { %v84_v28 = vmul.f32 %v71_v27, %v52_v24  ;;  %v86_v29 = vmul.f32 %v81_v26, %v57_v25 }
  0x90   :  { %89 = vst.msk [vmem:[%s175_s4 + $0x8] sm:$0xff] %vm87_vm2, %v84_v28 }
  0x91   :  { %91 = vst.msk [vmem:[%s175_s4 + $0x18] sm:$0xff] %vm87_vm2, %v86_v29 }

// kernel: _ptsm_apply.12
= control target key start
LH: loop header
LB: loop body
LE: loop exit
PB: predicated region body
PF: predicated region fallthrough
CT: control target
= control target key end

     0   :  { %s578_s15 = smov 0   ;;  %s580_s16 = smov 0   ;;  %s638_s0 = inlined_call_operand.vmem [shape: f32[16,32], index: 0, kind: input, shape index: {}]   ;;  %s639_s1 = inlined_call_operand.vmem [shape: f32[2,16,32], index: 1, kind: input, shape index: {}]   ;;  %s640_s2 = inlined_call_operand.vmem [shape: f32[2,2,1,32], index: 2, kind: input, shape index: {}]   ;;  %s641_s3 = inlined_call_operand.vmem [shape: f32[2,16,1], index: 3, kind: input, shape index: {}]   ;;  %s642_s4 = inlined_call_operand.vmem [shape: f32[2,16,32], index: 4, kind: output, shape index: {}]  }
   0x1   :  { %s582_s17 = smov 0   ;;  %s584_s18 = smov 0  }
   0x2   :  { %s586_s19 = smov 0  }
   0x3 LB: > { %s23_s20 = sadd.s32 1, %s542_s17  ;;  %s26_s21 = sadd.s32 1, %s546_s18  ;;  %s550_s19 = sphi %s586_s19, %s14_s19   ;;  %s546_s18 = sphi %s584_s18, %s646_s18   ;;  %s542_s17 = sphi %s582_s17, %s645_s17   ;;  %s538_s16 = sphi %s580_s16, %s644_s16   ;;  %s534_s15 = sphi %s578_s15, %s643_s15  }
   0x4   : > { %p24_p0 = scmp.ge.s32.totalorder %s23_s20, 2  ;;  %p458_p1 = scmp.ge.s32.totalorder %s550_s19, 1 }
   0x5   : > { %p219_p2 = scmp.lt.s32.totalorder %s550_s19, 5 }
   0x6   : > { %s648_s20 = smov (%p24_p0, %s23_s20), 0  ;;  %s650_s21 = smov (!%p24_p0, %s26_s21), %s546_s18 }
   0x7   : > { %p220_p3 = pnand %p458_p1, %p219_p2  ;;  %p28_p4 = scmp.ge.s32.totalorder %s650_s21, 2 }
   0x8   : > { %p270_p5 = scmp.lt.s32.totalorder (!%p220_p3), %s534_s15, 1  ;;  %p274_p6 = scmp.lt.s32.totalorder (!%p220_p3), %s538_s16, 1 }
   0x9   : > { %s652_s21 = smov (%p28_p4, %s650_s21), 0  ;;  %223 = sbr.rel (%p220_p3) target bundleno = 142 (0x8e), region = 36 }
   0xe   : > { %v552_v0 = vmov 0   ;;  %s654_s15 = smov (!%p270_p5, %s534_s15), 1  ;;  %s656_s16 = smov (!%p274_p6, %s538_s16), 1  ;;  %vm321_vm0 = vcmask 261120  }
   0xf   : > { %510 = vset.pattern.permute.xlu0 %v552_v0  ;;  %s460_s22 = sshll.u32 %s656_s16, 1  ;;  %s459_s5 = sshll.u32 %s654_s15, 3 }
  0x10   : > { %s279_s23 = sadd.s32 %s460_s22, %s654_s15  ;;  %s273_s11 = scalar_lea.vmem %s638_s0, %s459_s5 }
  0x11   : > { %s461_s24 = sshll.u32 %s279_s23, 3  ;;  %s288_s27 = scalar_lea.vmem %s640_s2, %s279_s23  ;;  %v306_v2 = vld [vmem:[%s273_s11] sm:$0xff] }
  0x12   : > { %s296_s30 = scalar_lea.vmem %s641_s3, %s461_s24  ;;  %s281_s8 = scalar_lea.vmem %s639_s1, %s461_s24  ;;  %v511_v5 = vld [vmem:[%s288_s27] ss:$0 sm:$0xff] }
  0x13   : > { %v309_v1 = vld [vmem:[%s296_s30] sm:$0xff]  ;;  %s304_s14 = scalar_lea.vmem %s642_s4, %s461_s24 }
  0x14   : > { %315 = vperm.xlu0 %510, %v309_v1   ;;  %v307_v3 = vld [vmem:[%s281_s8] sm:$0xff] }
  0x15   : > { %v308_v4 = vadd.f32 %v307_v3, %v306_v2 }
  0x86   : > { %v316_v6 = vpop.permute.xlu0 %315 }
  0x87   : > { %v318_v7 = vmul.f32 %v511_v5, %v316_v6 }
  0x89   : > { %v319_v8 = vadd.f32 %v318_v7, %v308_v4 }
  0x8b   : > { %v320_v9 = vmul.f32 5.656854, %v319_v8 }
  0x8d   : > { %322 = vst.msk [vmem:[%s304_s14] sm:$0xff] %vm321_vm0, %v320_v9 }
  0x8e PF: > { %s14_s19 = sadd.s32 1, %s550_s19   ;;  %s643_s15 = smov %s542_s17 }
  0x8f   : > { %p11_p7 = scmp.ge.s32.totalorder %s14_s19, 6   ;;  %s644_s16 = smov %s546_s18 }
  0x90   : > { %s645_s17 = smov %s648_s20  ;;  %s646_s18 = smov %s652_s21 }
  0x91   :  { %13 = sbr.rel (!%p11_p7) target bundleno = 3 (0x3), region = 75 }

// kernel: _ptsm_apply.11
= control target key start
LH: loop header
LB: loop body
LE: loop exit
PB: predicated region body
PF: predicated region fallthrough
CT: control target
= control target key end

     0   :  { %vm176_vm0 = vcmask 261120   ;;  %s343_s1 = inlined_call_operand.vmem [shape: bf16[256,32], index: 1, kind: input, shape index: {}]   ;;  %s344_s2 = inlined_call_operand.vmem [shape: f32[1,32], index: 2, kind: input, shape index: {}]   ;;  %s345_s0 = inlined_call_operand.vmem [shape: f32[8,256], index: 0, kind: input, shape index: {}]   ;;  %s346_s3 = inlined_call_operand.vmem [shape: f32[8,32], index: 3, kind: output, shape index: {}]  }
   0x1   :  { %v253_v0 = vld [vmem:[%s343_s1 + $0x38] sm:$0xff]  ;;  %v252_v2 = vld [vmem:[%s343_s1 + $0x30] sm:$0xff]  ;;  %v251_v4 = vld [vmem:[%s343_s1 + $0x28] sm:$0xff] }
   0x2   :  { %v261_v1 = vld [vmem:[%s343_s1 + $0x78] sm:$0xff]  ;;  %150 = vmatpush.bf16.msra.mxu0 %v253_v0  ;;  %v260_v3 = vld [vmem:[%s343_s1 + $0x70] sm:$0xff]  ;;  %v259_v5 = vld [vmem:[%s343_s1 + $0x68] sm:$0xff] }
   0x3   :  { %163 = vmatpush.bf16.msra.mxu1 %v261_v1  ;;  %v250_v6 = vld [vmem:[%s343_s1 + $0x20] sm:$0xff]  ;;  %v249_v8 = vld [vmem:[%s343_s1 + $0x18] sm:$0xff]  ;;  %v248_v10 = vld [vmem:[%s343_s1 + $0x10] sm:$0xff] }
   0x4   :  { %v258_v7 = vld [vmem:[%s343_s1 + $0x60] sm:$0xff]  ;;  %v257_v9 = vld [vmem:[%s343_s1 + $0x58] sm:$0xff]  ;;  %v256_v11 = vld [vmem:[%s343_s1 + $0x50] sm:$0xff] }
   0x5   :  { %v247_v12 = vld [vmem:[%s343_s1 + $0x8] sm:$0xff]  ;;  %v246_v14 = vld [vmem:[%s343_s1] sm:$0xff] }
   0x6   :  { %151 = vmatpush.bf16.msra.mxu0 %v252_v2  ;;  %v255_v13 = vld [vmem:[%s343_s1 + $0x48] sm:$0xff]  ;;  %v254_v15 = vld [vmem:[%s343_s1 + $0x40] sm:$0xff] }
   0x7   :  { %164 = vmatpush.bf16.msra.mxu1 %v260_v3  ;;  %v14_v16 = vld [vmem:[%s345_s0] sm:$0xff]  ;;  %v15_v17 = vld [vmem:[%s345_s0 + $0x8] sm:$0xff] }
   0x8   :  { %v16_v18 = vpack.c.bf16 %v14_v16, %v14_v16  ;;  %v17_v19 = vpack.c.bf16 %v15_v17, %v15_v17  ;;  %v262_v20 = vld [vmem:[%s344_s2] ss:$0 sm:$0xff] }
   0xa   :  { %152 = vmatpush.bf16.msra.mxu0 %v251_v4 }
   0xb   :  { %165 = vmatpush.bf16.msra.mxu1 %v259_v5 }
   0xe   :  { %153 = vmatpush.bf16.msra.mxu0 %v250_v6 }
   0xf   :  { %166 = vmatpush.bf16.msra.mxu1 %v258_v7 }
  0x12   :  { %154 = vmatpush.bf16.msra.mxu0 %v249_v8 }
  0x13   :  { %167 = vmatpush.bf16.msra.mxu1 %v257_v9 }
  0x16   :  { %155 = vmatpush.bf16.msra.mxu0 %v248_v10 }
  0x17   :  { %168 = vmatpush.bf16.msra.mxu1 %v256_v11 }
  0x1a   :  { %156 = vmatpush.bf16.msra.mxu0 %v247_v12 }
  0x1b   :  { %169 = vmatpush.bf16.msra.mxu1 %v255_v13 }
  0x1e   :  { %157 = vmatpush.bf16.msra.mxu0 %v246_v14 }
  0x1f   :  { %170 = vmatpush.bf16.msra.mxu1 %v254_v15 }
  0x21   :  { %158 = vmatmul.bf16.vlgmr.msra.gmra.mxu0 %v16_v18 }
  0x22   :  { %171 = vmatmul.bf16.vlgmr.msra.gmra.mxu1 %v17_v19 }
  0x9e   :  { %v159_v21 = vpop.f32.mrf.mxu0 }
  0x9f   :  { %v172_v22 = vpop.f32.mrf.mxu1  ;;  %v160_v23 = vadd.f32 %v262_v20, %v159_v21 }
  0xa1   :  { %v173_v24 = vadd.f32 %v172_v22, %v160_v23 }
  0xa3   :  { %177 = vst.msk [vmem:[%s346_s3] sm:$0xff] %vm176_vm0, %v173_v24 }
  0xa6   :  { %v161_v25 = vpop.f32.mrf.mxu0 }
  0xa7   :  { %v174_v26 = vpop.f32.mrf.mxu1 }

// kernel: _ptsm_apply.13
= control target key start
LH: loop header
LB: loop body
LE: loop exit
PB: predicated region body
PF: predicated region fallthrough
CT: control target
= control target key end

     0   :  { %vm49_vm0 = vcmask 261120   ;;  %vm79_vm1 = vcmask 257024   ;;  %vm127_vm2 = vcmask 519168   ;;  %s267_s1 = inlined_call_operand.vmem [shape: bf16[32,32], index: 1, kind: input, shape index: {}]   ;;  %s268_s3 = inlined_call_operand.vmem [shape: bf16[32,64], index: 3, kind: input, shape index: {}]   ;;  %s269_s0 = inlined_call_operand.vmem [shape: f32[32,32], index: 0, kind: input, shape index: {}]   ;;  %s270_s2 = inlined_call_operand.vmem [shape: f32[1,32], index: 2, kind: input, shape index: {}]   ;;  %s271_s4 = inlined_call_operand.vmem [shape: f32[1,64], index: 4, kind: input, shape index: {}]   ;;  %s272_s5 = inlined_call_operand.vmem [shape: bf16[32,32], index: 5, kind: output, shape index: {0}]   ;;  %s273_s6 = inlined_call_operand.vmem [shape: bf16[32,64], index: 6, kind: output, shape index: {1}]  }
   0x1   :  { %v161_v0 = vld [vmem:[%s267_s1 + $0x8] sm:$0xff]  ;;  %v160_v2 = vld [vmem:[%s267_s1] sm:$0xff]  ;;  %v25_v5 = vld [vmem:[%s269_s0 + $0x10] sm:$0xff] }
   0x2   :  { %v163_v1 = vld [vmem:[%s268_s3 + $0x8] sm:$0xff]  ;;  %v23_v3 = vld [vmem:[%s269_s0] sm:$0xff]  ;;  %62 = vmatpush.bf16.msra.mxu0 %v161_v0  ;;  %164 = vmatpush.bf16.msra.mxu2 %v161_v0  ;;  %v26_v6 = vld [vmem:[%s269_s0 + $0x18] sm:$0xff] }
   0x3   :  { %v24_v4 = vld [vmem:[%s269_s0 + $0x8] sm:$0xff]  ;;  %110 = vmatpush.bf16.msra.mxu1 %v163_v1  ;;  %166 = vmatpush.bf16.msra.mxu3 %v163_v1  ;;  %v162_v7 = vld [vmem:[%s268_s3] sm:$0xff]  ;;  %v28_v9 = vpack.c.bf16 %v26_v6, %v25_v5 }
   0x4   :  { %v27_v8 = vpack.c.bf16 %v24_v4, %v23_v3  ;;  %v168_v10 = vld [vmem:[%s270_s2] ss:$0 sm:$0xff] }
   0x5   :  { %v169_v11 = vld [vmem:[%s271_s4] ss:$0 sm:$0xff] }
   0x6   :  { %63 = vmatpush.bf16.msra.mxu0 %v160_v2  ;;  %165 = vmatpush.bf16.msra.mxu2 %v160_v2 }
   0x7   :  { %111 = vmatpush.bf16.msra.mxu1 %v162_v7  ;;  %167 = vmatpush.bf16.msra.mxu3 %v162_v7 }
   0x9   :  { %148 = vmatmul.msk.bf16.vlgmr.msra.gmra.mxu0 %vm49_vm0, %v27_v8  ;;  %149 = vmatmul.msk.bf16.vlgmr.msra.gmra.mxu2 %vm49_vm0, %v28_v9 }
   0xa   :  { %158 = vmatmul.msk.bf16.vlgmr.msra.gmra.mxu1 %vm49_vm0, %v27_v8  ;;  %159 = vmatmul.msk.bf16.vlgmr.msra.gmra.mxu3 %vm49_vm0, %v28_v9 }
  0x86   :  { %v65_v12 = vpop.f32.mrf.mxu0 }
  0x87   :  { %v66_v13 = vadd.f32 %v168_v10, %v65_v12  ;;  %v113_v14 = vpop.f32.mrf.mxu1 }
  0x88   :  { %v114_v15 = vadd.f32 %v169_v11, %v113_v14 }
  0x89   :  { %v75_v16 = vpack.c.bf16 %v66_v13, %v66_v13 }
  0x8a   :  { %v123_v17 = vpack.c.bf16 %v114_v15, %v114_v15 }
  0x8b   :  { %80 = vst.msk [vmem:[%s272_s5] sm:$0xf] %vm79_vm1, %v75_v16 }
  0x8c   :  { %128 = vst.msk [vmem:[%s273_s6] sm:$0xf] %vm127_vm2, %v123_v17  ;;  %v70_v18 = vpop.f32.mrf.mxu2 }
  0x8d   :  { %v71_v19 = vadd.f32 %v168_v10, %v70_v18  ;;  %v118_v20 = vpop.f32.mrf.mxu3 }
  0x8e   :  { %v119_v21 = vadd.f32 %v169_v11, %v118_v20  ;;  %v67_v22 = vpop.f32.mrf.mxu0 }
  0x8f   :  { %v77_v23 = vpack.c.bf16 %v71_v19, %v71_v19  ;;  %v68_v24 = vadd.f32 %v168_v10, %v67_v22  ;;  %v115_v25 = vpop.f32.mrf.mxu1 }
  0x90   :  { %v125_v26 = vpack.c.bf16 %v119_v21, %v119_v21  ;;  %v116_v27 = vadd.f32 %v169_v11, %v115_v25 }
  0x91   :  { %82 = vst.msk [vmem:[%s272_s5 + $0x8] sm:$0xf] %vm79_vm1, %v77_v23  ;;  %v76_v28 = vpack.c.bf16 %v68_v24, %v68_v24 }
  0x92   :  { %130 = vst.msk [vmem:[%s273_s6 + $0x8] sm:$0xf] %vm127_vm2, %v125_v26  ;;  %v124_v29 = vpack.c.bf16 %v116_v27, %v116_v27 }
  0x93   :  { %81 = vst.msk [vmem:[%s272_s5 + $0x4] sm:$0xf] %vm79_vm1, %v76_v28 }
  0x94   :  { %129 = vst.msk [vmem:[%s273_s6 + $0x4] sm:$0xf] %vm127_vm2, %v124_v29  ;;  %v72_v30 = vpop.f32.mrf.mxu2 }
  0x95   :  { %v73_v31 = vadd.f32 %v168_v10, %v72_v30  ;;  %v120_v32 = vpop.f32.mrf.mxu3 }
  0x96   :  { %v121_v33 = vadd.f32 %v169_v11, %v120_v32 }
  0x97   :  { %v78_v34 = vpack.c.bf16 %v73_v31, %v73_v31 }
  0x98   :  { %v126_v35 = vpack.c.bf16 %v121_v33, %v121_v33 }
  0x99   :  { %83 = vst.msk [vmem:[%s272_s5 + $0xc] sm:$0xf] %vm79_vm1, %v78_v34 }
  0x9a   :  { %131 = vst.msk [vmem:[%s273_s6 + $0xc] sm:$0xf] %vm127_vm2, %v126_v35 }

// kernel: _ptsm_apply.14
= control target key start
LH: loop header
LB: loop body
LE: loop exit
PB: predicated region body
PF: predicated region fallthrough
CT: control target
= control target key end

     0   :  { %s998_s27 = smov 0   ;;  %s1000_s28 = smov 0   ;;  %s1093_s0 = inlined_call_operand.vmem [shape: bf16[2,16,32], index: 0, kind: input, shape index: {}]   ;;  %s1094_s1 = inlined_call_operand.vmem [shape: bf16[2,16,64], index: 1, kind: input, shape index: {}]   ;;  %s1095_s2 = inlined_call_operand.vmem [shape: f32[2,1,16], index: 2, kind: input, shape index: {}]   ;;  %s1096_s3 = inlined_call_operand.vmem [shape: f32[2,16,32], index: 3, kind: input, shape index: {}]   ;;  %s1097_s4 = inlined_call_operand.vmem [shape: bf16[32,32], index: 4, kind: input, shape index: {}]   ;;  %s1098_s5 = inlined_call_operand.vmem [shape: f32[1,32], index: 5, kind: input, shape index: {}]   ;;  %s1099_s6 = inlined_call_operand.vmem [shape: f32[1,32], index: 6, kind: input, shape index: {}]   ;;  %s1100_s7 = inlined_call_operand.vmem [shape: f32[1,32], index: 7, kind: input, shape index: {}]   ;;  %s1101_s8 = inlined_call_operand.vmem [shape: f32[2,16,32], index: 8, kind: output, shape index: {}]  }
   0x1   :  { %s1002_s29 = smov 0  }
   0x2 LB: > { %s30_s30 = sadd.s32 1, %s942_s28  ;;  %p824_p0 = scmp.ge.s32.totalorder %s946_s29, 1  ;;  %s946_s29 = sphi %s1002_s29, %s18_s29   ;;  %s942_s28 = sphi %s1000_s28, %s1103_s28   ;;  %s938_s27 = sphi %s998_s27, %s1102_s27  }
   0x3   : > { %p32_p1 = scmp.ge.s32.totalorder %s30_s30, 2  ;;  %p318_p2 = scmp.lt.s32.totalorder %s946_s29, 3 }
   0x5   : > { %s1105_s30 = smov (%p32_p1, %s30_s30), 0  ;;  %p319_p3 = pnand %p824_p0, %p318_p2 }
   0x6   : > { %p378_p4 = scmp.lt.s32.totalorder (!%p319_p3), %s938_s27, 1  ;;  %s948_s13 = smov (!%p319_p3), 112  }
   0x7   : > { %322 = sbr.rel (%p319_p3) target bundleno = 1184 (0x4a0), region = 52  ;;  %s949_s20 = smov (!%p319_p3), 80  }
   0x8   : > { %s950_s21 = smov (!%p319_p3), 96   ;;  %s951_s26 = smov (!%p319_p3), 16  }
   0xc   : > { %s1107_s27 = smov (!%p378_p4, %s938_s27), 1  ;;  %vm431_vm0 = vcmask 130048   ;;  %v863_v60 = vld [vmem:[%s1097_s4 + $0x8] sm:$0xff]  ;;  %v862_v61 = vld [vmem:[%s1097_s4] sm:$0xff]  ;;  %vm604_vm1 = vcmask 261120  }
   0xd   : > { %s856_s9 = sshll.u32 %s1107_s27, 3  ;;  %s394_s19 = scalar_lea.vmem %s1095_s2, %s1107_s27 }
   0xe   : > { %s391_s12 = scalar_lea.vmem %s1094_s1, %s856_s9  ;;  %s385_s16 = scalar_lea.vmem %s1093_s0, %s856_s9  ;;  %v898_v6 = vld [vmem:[%s394_s19] ss:$0 sm:$0xff] }
   0xf   : > { %v1022_v0 = vld [vmem:[%s391_s12] sm:$0xff]  ;;  %s858_s9 = sshll.u32 %s1107_s27, 4 }
  0x10   : > { %504 = vrot.lane.b32.xlu0 %v1022_v0, %s948_s13  ;;  %v436_v1 = vsel %vm431_vm0, %v1022_v0, 0  ;;  %v860_v2 = vld [vmem:[%s385_s16] sm:$0xff]  ;;  %s403_s14 = scalar_lea.vmem %s1096_s3, %s858_s9 }
  0x11   : > { %445 = vmatpush.bf16.xpose.msra.mxu0 %v436_v1 }
  0x18   : > { %502 = vrot.lane.b32.xlu0 %v860_v2, %s948_s13  ;;  %841 = vmatmul.msk.bf16.vlgmr.msra.gmra.mxu0 %vm431_vm0, %v860_v2 }
  0x82   : > { %v505_v3 = vpop.permute.xlu0 %504 }
  0x83   : > { %v510_v4 = vsel %vm431_vm0, %v505_v3, 0 }
  0x84   : > { %519 = vmatpush.bf16.xpose.msra.mxu2 %v510_v4 }
  0x8a   : > { %v503_v5 = vpop.permute.xlu0 %502 }
  0x8b   : > { %843 = vmatmul.msk.bf16.vlgmr.msra.gmra.mxu2 %vm431_vm0, %v503_v5 }
  0x95   : > { %v447_v7 = vpop.f32.mrf.mxu0 }
  0x96   : > { %v452_v8 = vmul.f32 0.25, %v447_v7 }
  0x98   : > { %v457_v9 = vadd.f32 %v898_v6, %v452_v8  ;;  %v899_v8 = vld [vmem:[%s1098_s5] ss:$0 sm:$0xff] }
  0x9a   : > { %v459_v10 = vsel %vm431_vm0, %v457_v9, -inf }
  0x9b   : > { %460 = vmax.xlane.f32.xlu2 %v459_v10  ;;  %v622_v10 = vld [vmem:[%s403_s14] sm:$0xff] }
  0x9d   : > { %v449_v11 = vpop.f32.mrf.mxu0 }
  0x9e   : > { %v453_v12 = vmul.f32 0.25, %v449_v11 }
  0xa0   : > { %v458_v13 = vadd.f32 %v898_v6, %v453_v12 }
  0xa2   : > { %v462_v14 = vsel %vm431_vm0, %v458_v13, -inf }
  0xa3   : > { %463 = vmax.xlane.f32.xlu2 %v462_v14 }
  0xbb   : > { %553 = vrot.lane.b32.xlu2 %v1022_v0, %s949_s20 }
 0x10e   : > { %v521_v15 = vpop.f32.mrf.mxu2  ;;  %v461_v26 = vpop.xlane.xlu2 %460 }
 0x10f   : > { %v526_v16 = vmul.f32 0.25, %v521_v15  ;;  %v465_v30 = vsub.f32 %v457_v9, %v461_v26  ;;  %v623_v15 = vld [vmem:[%s403_s14 + $0x8] sm:$0xff] }
 0x111   : > { %v528_v17 = vadd.f32 %v898_v6, %v526_v16  ;;  %v467_v33 = vmul.f32 1.442695, %v465_v30 }
 0x113   : > { %v530_v18 = vsel %vm431_vm0, %v528_v17, -inf }
 0x114   : > { %531 = vmax.xlane.f32.xlu1 %v530_v18 }
 0x116   : > { %v523_v19 = vpop.f32.mrf.mxu2  ;;  %v464_v34 = vpop.xlane.xlu2 %463 }
 0x117   : > { %v527_v20 = vmul.f32 0.25, %v523_v19  ;;  %v466_v36 = vsub.f32 %v458_v13, %v464_v34  ;;  %v952_v19 = vmov 32.0  }
 0x119   : > { %v529_v21 = vadd.f32 %v898_v6, %v527_v20  ;;  %v469_v38 = vmul.f32 1.442695, %v466_v36 }
 0x11b   : > { %v533_v22 = vsel %vm431_vm0, %v529_v21, -inf }
 0x11c   : > { %534 = vmax.xlane.f32.xlu1 %v533_v22 }
 0x11e   : > { %v554_v43 = vpop.permute.xlu2 %553 }
 0x11f   : > { %566 = vmatpush.bf16.msra.mxu3 %v554_v43 }
 0x187   : > { %v532_v23 = vpop.xlane.xlu1 %531 }
 0x188   : > { %v536_v24 = vsub.f32 %v528_v17, %v532_v23 }
 0x18a   : > { %v538_v25 = vmul.f32 1.442695, %v536_v24 }
 0x18c   : > { %902 = vpow2.f32 %v538_v25 }
 0x18f   : > { %v535_v27 = vpop.xlane.xlu1 %534 }
 0x190   : > { %v537_v28 = vsub.f32 %v529_v21, %v535_v27 }
 0x192   : > { %v903_v29 = vpop.eup %902  ;;  %v540_v31 = vmul.f32 1.442695, %v537_v28 }
 0x193   : > { %v542_v32 = vsel %vm431_vm0, %v903_v29, 0.0 }
 0x194   : > { %904 = vpow2.f32 %v540_v31  ;;  %543 = vadd.xlane.f32.xlu0 %v542_v32 }
 0x195   : > { %906 = vpow2.f32 %v467_v33 }
 0x196   : > { %908 = vpow2.f32 %v469_v38 }
 0x19a   : > { %v905_v35 = vpop.eup %904 }
 0x19b   : > { %v545_v37 = vsel %vm431_vm0, %v905_v35, 0.0  ;;  %v907_v39 = vpop.eup %906 }
 0x19c   : > { %546 = vadd.xlane.f32.xlu1 %v545_v37  ;;  %v471_v40 = vsel %vm431_vm0, %v907_v39, 0.0  ;;  %v909_v41 = vpop.eup %908 }
 0x19d   : > { %v474_v42 = vsel %vm431_vm0, %v909_v41, 0.0 }
 0x1a4   : > { %472 = vadd.xlane.f32.xlu1 %v471_v40 }
 0x1ac   : > { %475 = vadd.xlane.f32.xlu1 %v474_v42 }
 0x1c5   : > { %482 = vrot.lane.b32.xlu1 %v1022_v0, %s950_s21  ;;  %s413_s21 = scalar_lea.vmem %s1101_s8, %s858_s9 }
 0x207   : > { %v544_v44 = vpop.xlane.xlu0 %543 }
 0x208   : > { %910 = vrcp.f32 %v544_v44 }
 0x20e   : > { %v911_v46 = vpop.eup %910 }
 0x20f   : > { %v547_v45 = vpop.xlane.xlu1 %546  ;;  %v550_v48 = vmul.f32 %v911_v46, %v903_v29 }
 0x210   : > { %912 = vrcp.f32 %v547_v45 }
 0x216   : > { %v913_v47 = vpop.eup %912 }
 0x217   : > { %v551_v49 = vmul.f32 %v913_v47, %v905_v35  ;;  %v473_v51 = vpop.xlane.xlu1 %472 }
 0x219   : > { %v552_v50 = vpack.c.bf16 %v551_v49, %v550_v48 }
 0x21b   : > { %844 = vmatmul.msk.bf16.vlgmr.msra.gmra.mxu3 %vm431_vm0, %v552_v50  ;;  %v900_v50 = vld [vmem:[%s1099_s6] ss:$0 sm:$0xff] }
 0x21f   : > { %v476_v52 = vpop.xlane.xlu1 %475 }
 0x220   : > { %914 = vrcp.f32 %v476_v52 }
 0x221   : > { %916 = vrcp.f32 %v473_v51 }
 0x222   : > { %918 = vrcp.f32 %v952_v19 }
 0x226   : > { %v915_v53 = vpop.eup %914 }
 0x227   : > { %v917_v54 = vpop.eup %916  ;;  %v480_v55 = vmul.f32 %v915_v53, %v909_v41  ;;  %v901_v53 = vld [vmem:[%s1100_s7] ss:$0 sm:$0xff] }
 0x228   : > { %v479_v57 = vmul.f32 %v917_v54, %v907_v39  ;;  %v919_v20 = vpop.eup %918 }
 0x229   : > { %v633_v21 = vmul.f32 32.0, %v919_v20  ;;  %vm637_vm2 = vweird.f32 %v919_v20 }
 0x22a   : > { %v481_v58 = vpack.c.bf16 %v480_v55, %v479_v57 }
 0x22b   : > { %v634_v22 = vsub.f32 1.0, %v633_v21 }
 0x22d   : > { %v635_v23 = vmul.f32 %v919_v20, %v634_v22 }
 0x22f   : > { %v636_v24 = vadd.f32 %v919_v20, %v635_v23 }
 0x231   : > { %v638_v25 = vsel %vm637_vm2, %v919_v20, %v636_v24 }
 0x237   : > { %v483_v56 = vpop.permute.xlu1 %482 }
 0x238   : > { %495 = vmatpush.bf16.msra.mxu1 %v483_v56 }
 0x23b   : > { %842 = vmatmul.msk.bf16.vlgmr.msra.gmra.mxu1 %vm431_vm0, %v481_v58 }
 0x23c   : > { %614 = vmatpush.bf16.msrb.mxu1 %v863_v60 }
 0x240   : > { %615 = vmatpush.bf16.msrb.mxu1 %v862_v61 }
 0x29e   : > { %v568_v59 = vpop.f32.mrf.mxu3 }
 0x2a6   : > { %v570_v62 = vpop.f32.mrf.mxu3 }
 0x2a7   : > { %v893_v63 = vpack.i.bf16 %v570_v62, %v568_v59 }
 0x2a9   : > { %894 = vrot.lane.b32.xlu2 %v893_v63, %s951_s26 }
 0x2b8   : > { %v497_v0 = vpop.f32.mrf.mxu1 }
 0x2c0   : > { %v499_v4 = vpop.f32.mrf.mxu1 }
 0x303   : > { %v895_v1 = vpop.permute.xlu2 %894 }
 0x304   : > { %v897_v2 = vunpack.i.h.bf16 %v895_v1  ;;  %v896_v3 = vunpack.i.l.bf16 %v895_v1 }
 0x306   : > { %v582_v5 = vsel %vm431_vm0, %v499_v4, %v897_v2  ;;  %v581_v6 = vsel %vm431_vm0, %v497_v0, %v896_v3 }
 0x307   : > { %v583_v7 = vpack.c.bf16 %v582_v5, %v581_v6 }
 0x309   : > { %853 = vmatmul.msk.bf16.vlgmr.msrb.gmra.mxu1 %vm604_vm1, %v583_v7 }
 0x386   : > { %v617_v9 = vpop.f32.mrf.mxu1 }
 0x387   : > { %v618_v11 = vadd.f32 %v899_v8, %v617_v9 }
 0x389   : > { %v624_v12 = vadd.f32 %v622_v10, %v618_v11 }
 0x38b   : > { %v626_v13 = vsel %vm604_vm1, %v624_v12, 0.0 }
 0x38c   : > { %627 = vadd.xlane.f32.xlu2 %v626_v13 }
 0x38e   : > { %v619_v14 = vpop.f32.mrf.mxu1 }
 0x38f   : > { %v620_v16 = vadd.f32 %v899_v8, %v619_v14 }
 0x391   : > { %v625_v17 = vadd.f32 %v623_v15, %v620_v16 }
 0x393   : > { %v629_v18 = vsel %vm604_vm1, %v625_v17, 0.0 }
 0x394   : > { %630 = vadd.xlane.f32.xlu0 %v629_v18 }
 0x3ff   : > { %v628_v26 = vpop.xlane.xlu2 %627 }
 0x400   : > { %v639_v27 = vmul.f32 %v638_v25, %v628_v26 }
 0x402   : > { %v641_v28 = vsub.f32 %v624_v12, %v639_v27 }
 0x404   : > { %v643_v29 = vmul.f32 %v641_v28, %v641_v28 }
 0x406   : > { %v645_v30 = vsel %vm604_vm1, %v643_v29, 0.0 }
 0x407   : > { %v631_v31 = vpop.xlane.xlu0 %630  ;;  %646 = vadd.xlane.f32.xlu1 %v645_v30 }
 0x408   : > { %v640_v32 = vmul.f32 %v638_v25, %v631_v31 }
 0x40a   : > { %v642_v33 = vsub.f32 %v625_v17, %v640_v32 }
 0x40c   : > { %v644_v34 = vmul.f32 %v642_v33, %v642_v33 }
 0x40e   : > { %v648_v35 = vsel %vm604_vm1, %v644_v34, 0.0 }
 0x40f   : > { %649 = vadd.xlane.f32.xlu0 %v648_v35 }
 0x47a   : > { %v647_v36 = vpop.xlane.xlu1 %646 }
 0x47b   : > { %v651_v37 = vmul.f32 %v647_v36, %v638_v25 }
 0x47d   : > { %v653_v38 = vadd.f32 1e-05, %v651_v37 }
 0x47f   : > { %920 = vrsqrt.f32 %v653_v38  ;;  %vm661_vm4 = vweird.f32 %v653_v38 }
 0x482   : > { %v650_v39 = vpop.xlane.xlu0 %649 }
 0x483   : > { %v652_v40 = vmul.f32 %v650_v39, %v638_v25 }
 0x485   : > { %v921_v41 = vpop.eup %920  ;;  %v654_v42 = vadd.f32 1e-05, %v652_v40 }
 0x486   : > { %v656_v43 = vmul.f32 %v921_v41, %v653_v38  ;;  %vm662_vm3 = vweird.f32 %v921_v41 }
 0x487   : > { %922 = vrsqrt.f32 %v654_v42  ;;  %vm663_vm5 = vmor %vm661_vm4, %vm662_vm3  ;;  %vm671_vm7 = vweird.f32 %v654_v42 }
 0x488   : > { %v657_v44 = vmul.f32 %v921_v41, %v656_v43 }
 0x48a   : > { %v658_v45 = vmul.f32 0.5, %v657_v44 }
 0x48c   : > { %v659_v46 = vsub.f32 1.5, %v658_v45 }
 0x48d   : > { %v923_v47 = vpop.eup %922 }
 0x48e   : > { %v660_v48 = vmul.f32 %v921_v41, %v659_v46  ;;  %v666_v49 = vmul.f32 %v923_v47, %v654_v42  ;;  %vm672_vm6 = vweird.f32 %v923_v47 }
 0x48f   : > { %vm673_vm8 = vmor %vm671_vm7, %vm672_vm6 }
 0x490   : > { %v664_v51 = vsel %vm663_vm5, %v921_v41, %v660_v48  ;;  %v667_v52 = vmul.f32 %v923_v47, %v666_v49 }
 0x491   : > { %v675_v54 = vmul.f32 %v664_v51, %v641_v28 }
 0x492   : > { %v668_v55 = vmul.f32 0.5, %v667_v52 }
 0x493   : > { %v681_v56 = vmul.f32 %v900_v50, %v675_v54 }
 0x494   : > { %v669_v57 = vsub.f32 1.5, %v668_v55 }
 0x495   : > { %v687_v58 = vadd.f32 %v901_v53, %v681_v56 }
 0x496   : > { %v670_v59 = vmul.f32 %v923_v47, %v669_v57 }
 0x497   : > { %689 = vst.msk [vmem:[%s413_s21] sm:$0xff] %vm604_vm1, %v687_v58 }
 0x498   : > { %v674_v60 = vsel %vm673_vm8, %v923_v47, %v670_v59 }
 0x499   : > { %v676_v61 = vmul.f32 %v674_v60, %v642_v33 }
 0x49b   : > { %v682_v62 = vmul.f32 %v900_v50, %v676_v61 }
 0x49d   : > { %v688_v63 = vadd.f32 %v901_v53, %v682_v62 }
 0x49f   : > { %690 = vst.msk [vmem:[%s413_s21 + $0x8] sm:$0xff] %vm604_vm1, %v688_v63 }
 0x4a0 PF: > { %s18_s29 = sadd.s32 1, %s946_s29   ;;  %s1102_s27 = smov %s942_s28 }
 0x4a1   : > { %p15_p5 = scmp.ge.s32.totalorder %s18_s29, 4   ;;  %s1103_s28 = smov %s1105_s30 }
 0x4a3   :  { %17 = sbr.rel (!%p15_p5) target bundleno = 2 (0x2), region = 91 }

// kernel: _ptsm_apply.15
= control target key start
LH: loop header
LB: loop body
LE: loop exit
PB: predicated region body
PF: predicated region fallthrough
CT: control target
= control target key end

     0   :  { %vm53_vm0 = vcmask 261120   ;;  %vm121_vm1 = vcmask 523264   ;;  %v325_v44 = vmov 32.0   ;;  %s449_s1 = inlined_call_operand.vmem [shape: bf16[32,64], index: 1, kind: input, shape index: {}]   ;;  %s450_s0 = inlined_call_operand.vmem [shape: f32[32,32], index: 0, kind: input, shape index: {}]   ;;  %s451_s2 = inlined_call_operand.vmem [shape: f32[1,64], index: 2, kind: input, shape index: {}]   ;;  %s452_s4 = inlined_call_operand.vmem [shape: f32[1,32], index: 4, kind: input, shape index: {}]   ;;  %s453_s3 = inlined_call_operand.vmem [shape: bf16[64,32], index: 3, kind: input, shape index: {}]   ;;  %s454_s5 = inlined_call_operand.vmem [shape: f32[1,32], index: 5, kind: input, shape index: {}]   ;;  %s455_s6 = inlined_call_operand.vmem [shape: f32[1,32], index: 6, kind: input, shape index: {}]   ;;  %s456_s7 = inlined_call_operand.vmem [shape: f32[32,32], index: 7, kind: output, shape index: {}]  }
   0x1   :  { %v299_v0 = vld [vmem:[%s449_s1 + $0x8] sm:$0xff]  ;;  %v298_v1 = vld [vmem:[%s449_s1] sm:$0xff]  ;;  %v29_v4 = vld [vmem:[%s450_s0 + $0x10] sm:$0xff]  ;;  %315 = vrcp.f32 %v325_v44 }
   0x2   :  { %v27_v2 = vld [vmem:[%s450_s0] sm:$0xff]  ;;  %v28_v3 = vld [vmem:[%s450_s0 + $0x8] sm:$0xff]  ;;  %66 = vmatpush.bf16.msra.mxu0 %v299_v0  ;;  %304 = vmatpush.bf16.msra.mxu3 %v299_v0  ;;  %v30_v5 = vld [vmem:[%s450_s0 + $0x18] sm:$0xff] }
   0x3   :  { %v31_v6 = vpack.c.bf16 %v28_v3, %v27_v2  ;;  %v32_v7 = vpack.c.bf16 %v30_v5, %v29_v4  ;;  %v303_v8 = vld [vmem:[%s453_s3 + $0x18] sm:$0xff]  ;;  %v302_v9 = vld [vmem:[%s453_s3 + $0x10] sm:$0xff]  ;;  %v301_v10 = vld [vmem:[%s453_s3 + $0x8] sm:$0xff] }
   0x4   :  { %132 = vmatpush.bf16.msra.mxu1 %v303_v8  ;;  %306 = vmatpush.bf16.msra.mxu2 %v303_v8  ;;  %v300_v11 = vld [vmem:[%s453_s3] sm:$0xff] }
   0x5   :  { %v311_v13 = vld [vmem:[%s451_s2] ss:$0 sm:$0xff] }
   0x6   :  { %67 = vmatpush.bf16.msra.mxu0 %v298_v1  ;;  %305 = vmatpush.bf16.msra.mxu3 %v298_v1  ;;  %v312_v27 = vld [vmem:[%s452_s4] ss:$0 sm:$0xff] }
   0x7   :  { %v316_v45 = vpop.eup %315 }
   0x8   :  { %133 = vmatpush.bf16.msra.mxu1 %v302_v9  ;;  %307 = vmatpush.bf16.msra.mxu2 %v302_v9  ;;  %v164_v46 = vmul.f32 32.0, %v316_v45  ;;  %vm168_vm2 = vweird.f32 %v316_v45 }
   0x9   :  { %278 = vmatmul.msk.bf16.vlgmr.msra.gmra.mxu0 %vm53_vm0, %v31_v6  ;;  %279 = vmatmul.msk.bf16.vlgmr.msra.gmra.mxu3 %vm53_vm0, %v32_v7 }
   0xa   :  { %v165_v47 = vsub.f32 1.0, %v164_v46 }
   0xc   :  { %134 = vmatpush.bf16.msra.mxu1 %v301_v10  ;;  %308 = vmatpush.bf16.msra.mxu2 %v301_v10  ;;  %v166_v48 = vmul.f32 %v316_v45, %v165_v47 }
   0xe   :  { %v167_v49 = vadd.f32 %v316_v45, %v166_v48 }
  0x10   :  { %135 = vmatpush.bf16.msra.mxu1 %v300_v11  ;;  %309 = vmatpush.bf16.msra.mxu2 %v300_v11  ;;  %v169_v50 = vsel %vm168_vm2, %v316_v45, %v167_v49 }
  0x86   :  { %v69_v12 = vpop.f32.mrf.mxu0 }
  0x87   :  { %v70_v14 = vadd.f32 %v311_v13, %v69_v12 }
  0x89   :  { %v79_v17 = vmax.f32 %v70_v14, 0.0 }
  0x8c   :  { %v74_v15 = vpop.f32.mrf.mxu3 }
  0x8d   :  { %v75_v20 = vadd.f32 %v311_v13, %v74_v15 }
  0x8e   :  { %v71_v16 = vpop.f32.mrf.mxu0 }
  0x8f   :  { %v72_v18 = vadd.f32 %v311_v13, %v71_v16  ;;  %v81_v24 = vmax.f32 %v75_v20, 0.0 }
  0x91   :  { %v80_v19 = vmax.f32 %v72_v18, 0.0 }
  0x93   :  { %v83_v21 = vpack.c.bf16 %v80_v19, %v79_v17 }
  0x94   :  { %v76_v22 = vpop.f32.mrf.mxu3 }
  0x95   :  { %v77_v23 = vadd.f32 %v311_v13, %v76_v22  ;;  %296 = vmatmul.msk.bf16.vlgmr.msra.gmra.mxu1 %vm121_vm1, %v83_v21 }
  0x97   :  { %v82_v25 = vmax.f32 %v77_v23, 0.0 }
  0x99   :  { %v84_v26 = vpack.c.bf16 %v82_v25, %v81_v24  ;;  %v313_v25 = vld [vmem:[%s454_s5] ss:$0 sm:$0xff] }
  0x9b   :  { %297 = vmatmul.msk.bf16.vlgmr.msra.gmra.mxu2 %vm121_vm1, %v84_v26 }
 0x112   :  { %v137_v28 = vpop.f32.mrf.mxu1 }
 0x113   :  { %v138_v29 = vadd.f32 %v312_v27, %v137_v28 }
 0x115   :  { %v147_v30 = vadd.f32 %v138_v29, %v27_v2 }
 0x117   :  { %v151_v31 = vsel %vm53_vm0, %v147_v30, 0.0 }
 0x118   :  { %152 = vadd.xlane.f32.xlu0 %v151_v31 }
 0x11a   :  { %v139_v32 = vpop.f32.mrf.mxu1 }
 0x11b   :  { %v140_v33 = vadd.f32 %v312_v27, %v139_v32 }
 0x11d   :  { %v148_v34 = vadd.f32 %v140_v33, %v28_v3 }
 0x11e   :  { %v142_v35 = vpop.f32.mrf.mxu2 }
 0x11f   :  { %v143_v36 = vadd.f32 %v312_v27, %v142_v35  ;;  %v154_v37 = vsel %vm53_vm0, %v148_v34, 0.0 }
 0x120   :  { %155 = vadd.xlane.f32.xlu0 %v154_v37 }
 0x121   :  { %v149_v38 = vadd.f32 %v143_v36, %v29_v4 }
 0x123   :  { %v157_v39 = vsel %vm53_vm0, %v149_v38, 0.0 }
 0x124   :  { %158 = vadd.xlane.f32.xlu1 %v157_v39 }
 0x126   :  { %v144_v40 = vpop.f32.mrf.mxu2 }
 0x127   :  { %v145_v41 = vadd.f32 %v312_v27, %v144_v40 }
 0x129   :  { %v150_v42 = vadd.f32 %v145_v41, %v30_v5 }
 0x12b   :  { %v160_v43 = vsel %vm53_vm0, %v150_v42, 0.0 }
 0x12c   :  { %161 = vadd.xlane.f32.xlu1 %v160_v43 }
 0x18b   :  { %v153_v51 = vpop.xlane.xlu0 %152 }
 0x18c   :  { %v170_v52 = vmul.f32 %v169_v50, %v153_v51 }
 0x18e   :  { %v174_v53 = vsub.f32 %v147_v30, %v170_v52  ;;  %v314_v30 = vld [vmem:[%s455_s6] ss:$0 sm:$0xff] }
 0x190   :  { %v178_v54 = vmul.f32 %v174_v53, %v174_v53 }
 0x192   :  { %v182_v55 = vsel %vm53_vm0, %v178_v54, 0.0 }
 0x193   :  { %183 = vadd.xlane.f32.xlu2 %v182_v55  ;;  %v156_v56 = vpop.xlane.xlu0 %155 }
 0x194   :  { %v171_v57 = vmul.f32 %v169_v50, %v156_v56 }
 0x196   :  { %v409_v58 = vsub.f32 %v148_v34, %v171_v57 }
 0x197   :  { %v159_v59 = vpop.xlane.xlu1 %158 }
 0x198   :  { %v172_v60 = vmul.f32 %v169_v50, %v159_v59  ;;  %v179_v61 = vmul.f32 %v409_v58, %v409_v58 }
 0x19a   :  { %v413_v62 = vsub.f32 %v149_v38, %v172_v60  ;;  %v185_v63 = vsel %vm53_vm0, %v179_v61, 0.0 }
 0x19b   :  { %186 = vadd.xlane.f32.xlu2 %v185_v63 }
 0x19c   :  { %v180_v0 = vmul.f32 %v413_v62, %v413_v62 }
 0x19e   :  { %v188_v1 = vsel %vm53_vm0, %v180_v0, 0.0 }
 0x19f   :  { %v162_v2 = vpop.xlane.xlu1 %161  ;;  %189 = vadd.xlane.f32.xlu0 %v188_v1 }
 0x1a0   :  { %v173_v3 = vmul.f32 %v169_v50, %v162_v2 }
 0x1a2   :  { %v419_v4 = vsub.f32 %v150_v42, %v173_v3 }
 0x1a4   :  { %v181_v5 = vmul.f32 %v419_v4, %v419_v4 }
 0x1a6   :  { %v191_v6 = vsel %vm53_vm0, %v181_v5, 0.0 }
 0x1a7   :  { %192 = vadd.xlane.f32.xlu1 %v191_v6 }
 0x206   :  { %v184_v7 = vpop.xlane.xlu2 %183 }
 0x207   :  { %v194_v8 = vmul.f32 %v184_v7, %v169_v50 }
 0x209   :  { %v198_v9 = vadd.f32 1e-05, %v194_v8 }
 0x20b   :  { %317 = vrsqrt.f32 %v198_v9  ;;  %vm208_vm4 = vweird.f32 %v198_v9 }
 0x20e   :  { %v187_v10 = vpop.xlane.xlu2 %186 }
 0x20f   :  { %v195_v11 = vmul.f32 %v187_v10, %v169_v50 }
 0x211   :  { %v318_v12 = vpop.eup %317  ;;  %v199_v13 = vadd.f32 1e-05, %v195_v11 }
 0x212   :  { %v203_v14 = vmul.f32 %v318_v12, %v198_v9  ;;  %v190_v15 = vpop.xlane.xlu0 %189  ;;  %vm209_vm3 = vweird.f32 %v318_v12 }
 0x213   :  { %319 = vrsqrt.f32 %v199_v13  ;;  %v196_v16 = vmul.f32 %v190_v15, %v169_v50  ;;  %vm210_vm5 = vmor %vm208_vm4, %vm209_vm3  ;;  %vm218_vm7 = vweird.f32 %v199_v13 }
 0x214   :  { %v204_v17 = vmul.f32 %v318_v12, %v203_v14 }
 0x215   :  { %v200_v18 = vadd.f32 1e-05, %v196_v16 }
 0x216   :  { %v205_v19 = vmul.f32 0.5, %v204_v17 }
 0x217   :  { %321 = vrsqrt.f32 %v200_v18  ;;  %vm228_vm10 = vweird.f32 %v200_v18 }
 0x218   :  { %v206_v20 = vsub.f32 1.5, %v205_v19 }
 0x219   :  { %v320_v21 = vpop.eup %319 }
 0x21a   :  { %v207_v22 = vmul.f32 %v318_v12, %v206_v20  ;;  %v213_v23 = vmul.f32 %v320_v21, %v199_v13  ;;  %v193_v24 = vpop.xlane.xlu1 %192  ;;  %vm219_vm6 = vweird.f32 %v320_v21 }
 0x21b   :  { %v197_v26 = vmul.f32 %v193_v24, %v169_v50  ;;  %vm220_vm8 = vmor %vm218_vm7, %vm219_vm6 }
 0x21c   :  { %v211_v27 = vsel %vm210_vm5, %v318_v12, %v207_v22  ;;  %v214_v28 = vmul.f32 %v320_v21, %v213_v23 }
 0x21d   :  { %v322_v29 = vpop.eup %321  ;;  %v242_v31 = vmul.f32 %v211_v27, %v174_v53  ;;  %v201_v32 = vadd.f32 1e-05, %v197_v26 }
 0x21e   :  { %v215_v33 = vmul.f32 0.5, %v214_v28  ;;  %v223_v34 = vmul.f32 %v322_v29, %v200_v18  ;;  %vm229_vm9 = vweird.f32 %v322_v29 }
 0x21f   :  { %v250_v35 = vmul.f32 %v313_v25, %v242_v31  ;;  %323 = vrsqrt.f32 %v201_v32  ;;  %vm230_vm11 = vmor %vm228_vm10, %vm229_vm9  ;;  %vm238_vm13 = vweird.f32 %v201_v32 }
 0x220   :  { %v216_v36 = vsub.f32 1.5, %v215_v33  ;;  %v224_v37 = vmul.f32 %v322_v29, %v223_v34 }
 0x221   :  { %v258_v38 = vadd.f32 %v314_v30, %v250_v35 }
 0x222   :  { %v217_v39 = vmul.f32 %v320_v21, %v216_v36  ;;  %v225_v40 = vmul.f32 0.5, %v224_v37 }
 0x223   :  { %262 = vst.msk [vmem:[%s456_s7] sm:$0xff] %vm53_vm0, %v258_v38 }
 0x224   :  { %v221_v41 = vsel %vm220_vm8, %v320_v21, %v217_v39  ;;  %v226_v42 = vsub.f32 1.5, %v225_v40 }
 0x225   :  { %v324_v43 = vpop.eup %323  ;;  %v243_v44 = vmul.f32 %v221_v41, %v409_v58 }
 0x226   :  { %v227_v45 = vmul.f32 %v322_v29, %v226_v42  ;;  %v233_v46 = vmul.f32 %v324_v43, %v201_v32  ;;  %vm239_vm12 = vweird.f32 %v324_v43 }
 0x227   :  { %v251_v47 = vmul.f32 %v313_v25, %v243_v44  ;;  %vm240_vm14 = vmor %vm238_vm13, %vm239_vm12 }
 0x228   :  { %v231_v48 = vsel %vm230_vm11, %v322_v29, %v227_v45  ;;  %v234_v49 = vmul.f32 %v324_v43, %v233_v46 }
 0x229   :  { %v259_v50 = vadd.f32 %v314_v30, %v251_v47  ;;  %v244_v51 = vmul.f32 %v231_v48, %v413_v62 }
 0x22a   :  { %v235_v52 = vmul.f32 0.5, %v234_v49 }
 0x22b   :  { %263 = vst.msk [vmem:[%s456_s7 + $0x8] sm:$0xff] %vm53_vm0, %v259_v50  ;;  %v252_v53 = vmul.f32 %v313_v25, %v244_v51 }
 0x22c   :  { %v236_v54 = vsub.f32 1.5, %v235_v52 }
 0x22d   :  { %v260_v55 = vadd.f32 %v314_v30, %v252_v53 }
 0x22e   :  { %v237_v56 = vmul.f32 %v324_v43, %v236_v54 }
 0x22f   :  { %264 = vst.msk [vmem:[%s456_s7 + $0x10] sm:$0xff] %vm53_vm0, %v260_v55 }
 0x230   :  { %v241_v57 = vsel %vm240_vm14, %v324_v43, %v237_v56 }
 0x231   :  { %v245_v58 = vmul.f32 %v241_v57, %v419_v4 }
 0x233   :  { %v253_v59 = vmul.f32 %v313_v25, %v245_v58 }
 0x235   :  { %v261_v60 = vadd.f32 %v314_v30, %v253_v59 }
 0x237   :  { %265 = vst.msk [vmem:[%s456_s7 + $0x18] sm:$0xff] %vm53_vm0, %v261_v60 }

// kernel: _ptsm_apply.19
= control target key start
LH: loop header
LB: loop body
LE: loop exit
PB: predicated region body
PF: predicated region fallthrough
CT: control target
= control target key end

     0   :  { %vm25_vm0 = vcmask 261120   ;;  %v221_v8 = vmov 32.0   ;;  %vm184_vm14 = vcmask 31744   ;;  %s321_s0 = inlined_call_operand.vmem [shape: f32[32,32], index: 0, kind: input, shape index: {}]   ;;  %s322_s1 = inlined_call_operand.vmem [shape: f32[1,32], index: 1, kind: input, shape index: {}]   ;;  %s323_s2 = inlined_call_operand.vmem [shape: f32[1,32], index: 2, kind: input, shape index: {}]   ;;  %s324_s4 = inlined_call_operand.vmem [shape: f32[1,4], index: 4, kind: input, shape index: {}]   ;;  %s325_s3 = inlined_call_operand.vmem [shape: bf16[32,4], index: 3, kind: input, shape index: {}]   ;;  %s326_s5 = inlined_call_operand.vmem [shape: f32[32,4], index: 5, kind: output, shape index: {}]  }
   0x1   :  { %v23_v0 = vld [vmem:[%s321_s0 + $0x10] sm:$0xff]  ;;  %v21_v1 = vld [vmem:[%s321_s0] sm:$0xff]  ;;  %v24_v4 = vld [vmem:[%s321_s0 + $0x18] sm:$0xff]  ;;  %211 = vrcp.f32 %v221_v8 }
   0x2   :  { %v32_v2 = vsel %vm25_vm0, %v23_v0, 0.0  ;;  %v26_v3 = vsel %vm25_vm0, %v21_v1, 0.0  ;;  %v22_v5 = vld [vmem:[%s321_s0 + $0x8] sm:$0xff]  ;;  %v35_v6 = vsel %vm25_vm0, %v24_v4, 0.0  ;;  %v203_v40 = vld [vmem:[%s325_s3] sm:$0xff] }
   0x3   :  { %33 = vadd.xlane.f32.xlu1 %v32_v2  ;;  %27 = vadd.xlane.f32.xlu0 %v26_v3  ;;  %v29_v7 = vsel %vm25_vm0, %v22_v5, 0.0  ;;  %v204_v35 = vld [vmem:[%s325_s3 + $0x8] sm:$0xff] }
   0x4   :  { %171 = vmatpush.bf16.msra.mxu0 %v204_v35  ;;  %205 = vmatpush.bf16.msra.mxu1 %v204_v35 }
   0x7   :  { %v212_v9 = vpop.eup %211 }
   0x8   :  { %v39_v10 = vmul.f32 32.0, %v212_v9  ;;  %vm43_vm1 = vweird.f32 %v212_v9  ;;  %172 = vmatpush.bf16.msra.mxu0 %v203_v40  ;;  %206 = vmatpush.bf16.msra.mxu1 %v203_v40 }
   0xa   :  { %v40_v11 = vsub.f32 1.0, %v39_v10  ;;  %v208_v10 = vld [vmem:[%s322_s1] ss:$0 sm:$0xff] }
   0xb   :  { %36 = vadd.xlane.f32.xlu1 %v35_v6  ;;  %30 = vadd.xlane.f32.xlu0 %v29_v7 }
   0xc   :  { %v41_v12 = vmul.f32 %v212_v9, %v40_v11 }
   0xe   :  { %v42_v13 = vadd.f32 %v212_v9, %v41_v12 }
  0x10   :  { %v44_v14 = vsel %vm43_vm1, %v212_v9, %v42_v13 }
  0x76   :  { %v34_v15 = vpop.xlane.xlu1 %33  ;;  %v28_v16 = vpop.xlane.xlu0 %27 }
  0x77   :  { %v47_v17 = vmul.f32 %v44_v14, %v34_v15  ;;  %v45_v18 = vmul.f32 %v44_v14, %v28_v16 }
  0x79   :  { %v268_v19 = vsub.f32 %v23_v0, %v47_v17  ;;  %v270_v20 = vsub.f32 %v21_v1, %v45_v18  ;;  %v209_v17 = vld [vmem:[%s323_s2] ss:$0 sm:$0xff] }
  0x7b   :  { %v55_v21 = vmul.f32 %v268_v19, %v268_v19  ;;  %v53_v22 = vmul.f32 %v270_v20, %v270_v20 }
  0x7d   :  { %v63_v23 = vsel %vm25_vm0, %v55_v21, 0.0  ;;  %v57_v24 = vsel %vm25_vm0, %v53_v22, 0.0 }
  0x7e   :  { %v37_v25 = vpop.xlane.xlu1 %36  ;;  %64 = vadd.xlane.f32.xlu0 %v63_v23  ;;  %58 = vadd.xlane.f32.xlu2 %v57_v24  ;;  %v31_v26 = vpop.xlane.xlu0 %30 }
  0x7f   :  { %v48_v27 = vmul.f32 %v44_v14, %v37_v25  ;;  %v46_v28 = vmul.f32 %v44_v14, %v31_v26 }
  0x81   :  { %v278_v29 = vsub.f32 %v24_v4, %v48_v27  ;;  %v280_v30 = vsub.f32 %v22_v5, %v46_v28 }
  0x83   :  { %v56_v31 = vmul.f32 %v278_v29, %v278_v29  ;;  %v54_v32 = vmul.f32 %v280_v30, %v280_v30 }
  0x85   :  { %v66_v33 = vsel %vm25_vm0, %v56_v31, 0.0  ;;  %v60_v34 = vsel %vm25_vm0, %v54_v32, 0.0 }
  0x86   :  { %67 = vadd.xlane.f32.xlu1 %v66_v33  ;;  %61 = vadd.xlane.f32.xlu2 %v60_v34 }
  0xf1   :  { %v59_v36 = vpop.xlane.xlu2 %58  ;;  %v65_v37 = vpop.xlane.xlu0 %64 }
  0xf2   :  { %v69_v38 = vmul.f32 %v59_v36, %v44_v14  ;;  %v71_v39 = vmul.f32 %v65_v37, %v44_v14 }
  0xf4   :  { %v73_v41 = vadd.f32 1e-05, %v69_v38  ;;  %v75_v42 = vadd.f32 1e-05, %v71_v39 }
  0xf6   :  { %213 = vrsqrt.f32 %v73_v41  ;;  %vm103_vm4 = vweird.f32 %v75_v42  ;;  %vm83_vm5 = vweird.f32 %v73_v41 }
  0xf7   :  { %215 = vrsqrt.f32 %v75_v42 }
  0xf9   :  { %v68_v43 = vpop.xlane.xlu1 %67  ;;  %v62_v44 = vpop.xlane.xlu2 %61 }
  0xfa   :  { %v72_v45 = vmul.f32 %v68_v43, %v44_v14  ;;  %v70_v46 = vmul.f32 %v62_v44, %v44_v14 }
  0xfc   :  { %v214_v47 = vpop.eup %213  ;;  %v76_v48 = vadd.f32 1e-05, %v72_v45  ;;  %v74_v49 = vadd.f32 1e-05, %v70_v46 }
  0xfd   :  { %v216_v50 = vpop.eup %215  ;;  %v78_v51 = vmul.f32 %v214_v47, %v73_v41  ;;  %vm84_vm3 = vweird.f32 %v214_v47 }
  0xfe   :  { %v98_v52 = vmul.f32 %v216_v50, %v75_v42  ;;  %217 = vrsqrt.f32 %v76_v48  ;;  %vm104_vm2 = vweird.f32 %v216_v50  ;;  %vm85_vm7 = vmor %vm83_vm5, %vm84_vm3  ;;  %vm113_vm10 = vweird.f32 %v76_v48 }
  0xff   :  { %v79_v53 = vmul.f32 %v214_v47, %v78_v51  ;;  %219 = vrsqrt.f32 %v74_v49  ;;  %vm105_vm6 = vmor %vm103_vm4, %vm104_vm2  ;;  %vm93_vm12 = vweird.f32 %v74_v49 }
 0x100   :  { %v99_v54 = vmul.f32 %v216_v50, %v98_v52 }
 0x101   :  { %v80_v55 = vmul.f32 0.5, %v79_v53 }
 0x102   :  { %v100_v56 = vmul.f32 0.5, %v99_v54 }
 0x103   :  { %v81_v57 = vsub.f32 1.5, %v80_v55 }
 0x104   :  { %v218_v58 = vpop.eup %217  ;;  %v101_v59 = vsub.f32 1.5, %v100_v56 }
 0x105   :  { %v220_v60 = vpop.eup %219  ;;  %v108_v61 = vmul.f32 %v218_v58, %v76_v48  ;;  %v82_v62 = vmul.f32 %v214_v47, %v81_v57  ;;  %vm114_vm8 = vweird.f32 %v218_v58 }
 0x106   :  { %v102_v63 = vmul.f32 %v216_v50, %v101_v59  ;;  %v88_v0 = vmul.f32 %v220_v60, %v74_v49  ;;  %vm94_vm9 = vweird.f32 %v220_v60  ;;  %vm115_vm11 = vmor %vm113_vm10, %vm114_vm8 }
 0x107   :  { %v109_v1 = vmul.f32 %v218_v58, %v108_v61  ;;  %v86_v5 = vsel %vm85_vm7, %v214_v47, %v82_v62  ;;  %vm95_vm13 = vmor %vm93_vm12, %vm94_vm9 }
 0x108   :  { %v89_v2 = vmul.f32 %v220_v60, %v88_v0  ;;  %v106_v3 = vsel %vm105_vm6, %v216_v50, %v102_v63  ;;  %v117_v11 = vmul.f32 %v86_v5, %v270_v20 }
 0x109   :  { %v110_v4 = vmul.f32 0.5, %v109_v1  ;;  %v119_v8 = vmul.f32 %v106_v3, %v268_v19 }
 0x10a   :  { %v90_v6 = vmul.f32 0.5, %v89_v2  ;;  %v125_v21 = vmul.f32 %v208_v10, %v117_v11 }
 0x10b   :  { %v111_v7 = vsub.f32 1.5, %v110_v4  ;;  %v127_v18 = vmul.f32 %v208_v10, %v119_v8 }
 0x10c   :  { %v91_v9 = vsub.f32 1.5, %v90_v6  ;;  %v133_v25 = vadd.f32 %v209_v17, %v125_v21 }
 0x10d   :  { %v112_v12 = vmul.f32 %v218_v58, %v111_v7  ;;  %v135_v23 = vadd.f32 %v209_v17, %v127_v18 }
 0x10e   :  { %v92_v13 = vmul.f32 %v220_v60, %v91_v9 }
 0x10f   :  { %v116_v14 = vsel %vm115_vm11, %v218_v58, %v112_v12 }
 0x110   :  { %v120_v15 = vmul.f32 %v116_v14, %v278_v29  ;;  %v96_v16 = vsel %vm95_vm13, %v220_v60, %v92_v13  ;;  %v210_v29 = vld [vmem:[%s324_s4] ss:$0 sm:$0xff] }
 0x111   :  { %v118_v19 = vmul.f32 %v96_v16, %v280_v30 }
 0x112   :  { %v128_v22 = vmul.f32 %v208_v10, %v120_v15 }
 0x113   :  { %v126_v20 = vmul.f32 %v208_v10, %v118_v19 }
 0x114   :  { %v136_v24 = vadd.f32 %v209_v17, %v128_v22 }
 0x115   :  { %v134_v26 = vadd.f32 %v209_v17, %v126_v20 }
 0x116   :  { %v138_v27 = vpack.c.bf16 %v136_v24, %v135_v23 }
 0x117   :  { %v137_v28 = vpack.c.bf16 %v134_v26, %v133_v25 }
 0x118   :  { %202 = vmatmul.msk.bf16.vlgmr.msra.gmra.mxu1 %vm25_vm0, %v138_v27 }
 0x119   :  { %201 = vmatmul.msk.bf16.vlgmr.msra.gmra.mxu0 %vm25_vm0, %v137_v28 }
 0x195   :  { %v179_v31 = vpop.f32.mrf.mxu1 }
 0x196   :  { %v174_v30 = vpop.f32.mrf.mxu0  ;;  %v180_v32 = vadd.f32 %v210_v29, %v179_v31 }
 0x197   :  { %v175_v33 = vadd.f32 %v210_v29, %v174_v30 }
 0x198   :  { %187 = vst.msk [vmem:[%s326_s5 + $0x10] sm:$0xff] %vm184_vm14, %v180_v32 }
 0x199   :  { %185 = vst.msk [vmem:[%s326_s5] sm:$0xff] %vm184_vm14, %v175_v33 }
 0x19d   :  { %v181_v34 = vpop.f32.mrf.mxu1 }
 0x19e   :  { %v176_v35 = vpop.f32.mrf.mxu0  ;;  %v182_v36 = vadd.f32 %v210_v29, %v181_v34 }
 0x19f   :  { %v177_v37 = vadd.f32 %v210_v29, %v176_v35 }
 0x1a0   :  { %188 = vst.msk [vmem:[%s326_s5 + $0x18] sm:$0xff] %vm184_vm14, %v182_v36 }
 0x1a1   :  { %186 = vst.msk [vmem:[%s326_s5 + $0x8] sm:$0xff] %vm184_vm14, %v177_v37 }

</bundles_post_ra>
